<compile_context>
chip_gen: v5e
topology: v5e:2x2
jax: 0.10.0
libtpu: 0.0.40
codegen_flags: <defaults>
</compile_context>

<pallas_src>
import functools

import jax
import jax.numpy as jnp
from jax.experimental import pallas as pl
from jax.experimental.pallas import tpu as pltpu


# --------------------------- tiled linear: x @ w.T -------------------------- #
def _linear_nt_kernel(x_ref, w_ref, o_ref, acc_ref):
    # x: (tm, tk), w: (tf, tk) in torch Linear layout; contract the last dims
    # (NT matmul on the MXU -> no host-side weight transpose, no in-kernel .T).
    @pl.when(pl.program_id(2) == 0)
    def _():
        acc_ref[...] = jnp.zeros_like(acc_ref)

    acc_ref[...] += jax.lax.dot_general(
        x_ref[...], w_ref[...], (((1,), (1,)), ((), ())),
        preferred_element_type=jnp.float32)

    @pl.when(pl.program_id(2) == pl.num_programs(2) - 1)
    def _():
        o_ref[...] = acc_ref[...].astype(o_ref.dtype)


def _linear_nt_bias_kernel(x_ref, w_ref, b_ref, o_ref, acc_ref):
    @pl.when(pl.program_id(2) == 0)
    def _():
        acc_ref[...] = jnp.zeros_like(acc_ref)

    acc_ref[...] += jax.lax.dot_general(
        x_ref[...], w_ref[...], (((1,), (1,)), ((), ())),
        preferred_element_type=jnp.float32)

    @pl.when(pl.program_id(2) == pl.num_programs(2) - 1)
    def _():
        o_ref[...] = (acc_ref[...] + b_ref[...].astype(jnp.float32)).astype(o_ref.dtype)


def _pick_tile(dim, target, align):
    """Largest `align`-aligned tile <= target that evenly divides dim (or full dim)."""
    if dim <= target:
        return dim                      # "equal the full array dim" is always legal
    t = (target // align) * align
    while t >= align:
        if dim % t == 0:
            return t
        t -= align
    # TODO(synk): explicit tail masking (or input padding) for ragged dims.
    raise ValueError(f"dim={dim}: no {align}-aligned tile <= {target} divides it")


def pallas_linear(x2d, w, b=None, *, tm=256, tf=512, tk=512):
    """x2d: (M, K); w: (F, K) torch Linear layout; optional b: (1, F) -> (M, F)."""
    M, K = x2d.shape
    F = w.shape[0]
    tm = _pick_tile(M, tm, 8)
    tk = _pick_tile(K, tk, 128)
    tf = _pick_tile(F, tf, 128)
    grid = (M // tm, F // tf, K // tk)

    in_specs = [
        pl.BlockSpec((tm, tk), lambda i, j, k: (i, k)),
        pl.BlockSpec((tf, tk), lambda i, j, k: (j, k)),   # torch (F, K) layout, no .T
    ]
    operands = [x2d, w]
    kernel = _linear_nt_kernel
    if b is not None:
        in_specs.append(pl.BlockSpec((1, tf), lambda i, j, k: (0, j)))
        operands.append(b)
        kernel = _linear_nt_bias_kernel

    return pl.pallas_call(
        kernel,
        out_shape=jax.ShapeDtypeStruct((M, F), x2d.dtype),
        grid=grid,
        in_specs=in_specs,
        out_specs=pl.BlockSpec((tm, tf), lambda i, j, k: (i, j)),
        scratch_shapes=[pltpu.VMEM((tm, tf), jnp.float32)],
        compiler_params=pltpu.CompilerParams(
            dimension_semantics=("parallel", "parallel", "arbitrary")),
    )(*operands)


# ------------------ differential attention (flash-style) ------------------- #
def _diff_attn_kernel(lam_ref, q_ref, k_ref, v_ref, o_ref,
                      m1_ref, l1_ref, acc1_ref, m2_ref, l2_ref, acc2_ref, *, dh):
    ki = pl.program_id(3)

    @pl.when(ki == 0)
    def _():
        m1_ref[...] = jnp.full_like(m1_ref, -jnp.inf)
        m2_ref[...] = jnp.full_like(m2_ref, -jnp.inf)
        l1_ref[...] = jnp.zeros_like(l1_ref)
        l2_ref[...] = jnp.zeros_like(l2_ref)
        acc1_ref[...] = jnp.zeros_like(acc1_ref)
        acc2_ref[...] = jnp.zeros_like(acc2_ref)

    q = q_ref[0]                        # (tq,  hd); scale already folded into qkv_w
    k = k_ref[0]                        # (tkv, hd)
    v = v_ref[0]                        # (tkv, hd)

    contract_last = (((1,), (1,)), ((), ()))        # q @ k^T without transposing k
    # Per-half scores: true dh-wide contractions (no full-C masked matmuls).
    s1 = jax.lax.dot_general(q[:, :dh], k[:, :dh], contract_last,
                             preferred_element_type=jnp.float32)    # (tq, tkv)
    s2 = jax.lax.dot_general(q[:, dh:], k[:, dh:], contract_last,
                             preferred_element_type=jnp.float32)

    # Online softmax, branch 1.
    m1_new = jnp.maximum(m1_ref[...], s1.max(axis=-1, keepdims=True))
    a1 = jnp.exp(m1_ref[...] - m1_new)
    p1 = jnp.exp(s1 - m1_new)
    l1_ref[...] = a1 * l1_ref[...] + p1.sum(axis=-1, keepdims=True)
    acc1_ref[...] = a1 * acc1_ref[...] + jnp.dot(
        p1.astype(v.dtype), v, preferred_element_type=jnp.float32)
    m1_ref[...] = m1_new

    # Online softmax, branch 2.
    m2_new = jnp.maximum(m2_ref[...], s2.max(axis=-1, keepdims=True))
    a2 = jnp.exp(m2_ref[...] - m2_new)
    p2 = jnp.exp(s2 - m2_new)
    l2_ref[...] = a2 * l2_ref[...] + p2.sum(axis=-1, keepdims=True)
    acc2_ref[...] = a2 * acc2_ref[...] + jnp.dot(
        p2.astype(v.dtype), v, preferred_element_type=jnp.float32)
    m2_ref[...] = m2_new

    @pl.when(ki == pl.num_programs(3) - 1)
    def _():
        lam = lam_ref[0]
        o1 = acc1_ref[...] * pl.reciprocal(l1_ref[...], approx=True)
        o2 = acc2_ref[...] * pl.reciprocal(l2_ref[...], approx=True)
        o_ref[0] = (o1 - lam * o2).astype(o_ref.dtype)


def diff_attention_forward(x, params, num_heads, lambda_init, *, tq=128, tkv=128):
    B, N, C = x.shape
    assert C % num_heads == 0
    head_dim = C // num_heads
    dh = head_dim // 2
    # Per-head BlockSpec slicing needs a 128-lane-aligned head block.
    # TODO(synk): pack two heads per 128-lane block (or mask fallback) for head_dim < 128.
    assert head_dim % 128 == 0, "this kernel requires head_dim % 128 == 0"
    tq = min(tq, N)
    tkv = min(tkv, N)
    assert N % tq == 0 and N % tkv == 0, "N must be divisible by the q/kv tiles"

    scale = head_dim ** (-0.5)          # full head_dim, as in the PyTorch module

    # Fold the q-scale into the first C output rows of the torch-layout qkv weight
    # (rides the qkv matmul; removes the per-token (N, C) VPU multiply in-kernel).
    row = jax.lax.broadcasted_iota(jnp.int32, (3 * C, 1), 0)
    qkv_w = jnp.where(row < C, params["qkv_w"] * scale, params["qkv_w"])

    # --- qkv projection: tiled NT matmul, qkv_bias=False -> no bias operand ---
    qkv = pallas_linear(x.reshape(B * N, C), qkv_w)              # (B*N, 3C)
    qkv = qkv.reshape(B, N, 3 * C)                               # free reshape

    # --- get_lambda(): mean(exp(lq1*lk1) - exp(lq2*lk2) + lambda_init) ---
    lam = jnp.mean(jnp.exp(params["lambda_q1"] * params["lambda_k1"])
                   - jnp.exp(params["lambda_q2"] * params["lambda_k2"])
                   + lambda_init).reshape(1).astype(jnp.float32)

    # --- flash-style differential attention ---
    H = num_heads
    grid = (B, H, N // tq, N // tkv)
    # Per-head q/k/v blocks come straight out of the lane-dense (B, N, 3C) qkv
    # slab via three BlockSpecs on the same array (no 5-D transpose, no masks).
    q_spec = pl.BlockSpec((1, tq, head_dim), lambda b, h, qi, ki: (b, qi, h))
    k_spec = pl.BlockSpec((1, tkv, head_dim), lambda b, h, qi, ki: (b, ki, H + h))
    v_spec = pl.BlockSpec((1, tkv, head_dim), lambda b, h, qi, ki: (b, ki, 2 * H + h))
    o_spec = pl.BlockSpec((1, tq, head_dim), lambda b, h, qi, ki: (b, qi, h))

    o = pl.pallas_call(
        functools.partial(_diff_attn_kernel, dh=dh),
        out_shape=jax.ShapeDtypeStruct((B, N, C), x.dtype),
        grid=grid,
        in_specs=[
            pl.BlockSpec(memory_space=pltpu.MemorySpace.SMEM),   # lambda scalar
            q_spec, k_spec, v_spec,
        ],
        out_specs=o_spec,
        scratch_shapes=[
            pltpu.VMEM((tq, 1), jnp.float32),          # m1
            pltpu.VMEM((tq, 1), jnp.float32),          # l1
            pltpu.VMEM((tq, head_dim), jnp.float32),   # acc1
            pltpu.VMEM((tq, 1), jnp.float32),          # m2
            pltpu.VMEM((tq, 1), jnp.float32),          # l2
            pltpu.VMEM((tq, head_dim), jnp.float32),   # acc2
        ],
        compiler_params=pltpu.CompilerParams(
            dimension_semantics=("parallel", "parallel", "parallel", "arbitrary")),
    )(lam, qkv, qkv, qkv)

    # --- output projection (tiled NT matmul + bias) ---
    # TODO(synk): optionally fuse the proj matmul into the attention flush to skip
    # the HBM round trip of the (B, N, C) intermediate on mem-bound configs.
    out = pallas_linear(o.reshape(B * N, C), params["proj_w"],
                        params["proj_b"].reshape(1, C))
    return out.reshape(B, N, C)


# ------------------------------ pure-JAX reference ------------------------- #
def diff_attention_reference(x, params, num_heads, lambda_init):
    with jax.default_matmul_precision("highest"):
        B, N, C = x.shape
        hd = C // num_heads
        dh = hd // 2
        scale = hd ** (-0.5)

        qkv = jnp.einsum("bnc,fc->bnf", x, params["qkv_w"])
        qkv = qkv.reshape(B, N, 3, num_heads, hd).transpose(2, 0, 3, 1, 4)
        q, k, v = qkv[0], qkv[1], qkv[2]
        q1, q2 = q[..., :dh], q[..., dh:]
        k1, k2 = k[..., :dh], k[..., dh:]

        lam = jnp.mean(jnp.exp(params["lambda_q1"] * params["lambda_k1"])
                       - jnp.exp(params["lambda_q2"] * params["lambda_k2"])
                       + lambda_init)

        a1 = jnp.einsum("bhnd,bhmd->bhnm", q1, k1) * scale
        a2 = jnp.einsum("bhnd,bhmd->bhnm", q2, k2) * scale
        attn = jax.nn.softmax(a1, axis=-1) - lam * jax.nn.softmax(a2, axis=-1)
        o = jnp.einsum("bhnm,bhmd->bhnd", attn, v)
        o = o.transpose(0, 2, 1, 3).reshape(B, N, C)
        return jnp.einsum("bnc,fc->bnf", o, params["proj_w"]) + params["proj_b"]


# ----------------------------------- main ---------------------------------- #
if __name__ == "__main__":
    B, N, C = 2, 256, 256
    num_heads = 2
    head_dim = C // num_heads          # 128 (dh = 64)
    lambda_init = 0.8

    key = jax.random.PRNGKey(0)
    ks = jax.random.split(key, 8)
    params = {
        "qkv_w": jax.random.normal(ks[0], (3 * C, C), jnp.float32) * 0.05,  # torch (out, in)
        "proj_w": jax.random.normal(ks[1], (C, C), jnp.float32) * 0.05,
        "proj_b": jax.random.normal(ks[2], (C,), jnp.float32) * 0.05,
        "lambda_q1": jax.random.normal(ks[3], (head_dim,), jnp.float32),
        "lambda_k1": jax.random.normal(ks[4], (head_dim,), jnp.float32),
        "lambda_q2": jax.random.normal(ks[5], (head_dim,), jnp.float32),
        "lambda_k2": jax.random.normal(ks[6], (head_dim,), jnp.float32),
    }
    x = jax.random.normal(ks[7], (B, N, C), jnp.float32)

    out = diff_attention_forward(x, params, num_heads, lambda_init)
    out = jax.block_until_ready(out)

    ref = diff_attention_reference(x, params, num_heads, lambda_init)
    assert out.shape == (B, N, C)
    assert jnp.allclose(out, ref, atol=2e-3, rtol=2e-3), "mismatch vs. reference"

    print("KERNEL_OK")
</pallas_src>

<mosaic_0001>
module attributes {stable_mosaic.version = 11 : i64} {
  func.func @_linear_nt_kernel(%arg0: i32, %arg1: i32, %arg2: i32, %arg3: memref<256x256xf32, #tpu.memory_space<vmem>>, %arg4: memref<384x256xf32, #tpu.memory_space<vmem>>, %arg5: memref<256x384xf32, #tpu.memory_space<vmem>>, %arg6: memref<256x384xf32, #tpu.memory_space<vmem>>) attributes {dimension_semantics = [#tpu.dimension_semantics<parallel>, #tpu.dimension_semantics<parallel>, #tpu.dimension_semantics<arbitrary>], iteration_bounds = array<i64: 2, 2, 1>, scalar_prefetch = 0 : i64, scratch_operands = 1 : i64, tpu.core_type = #tpu.core_type<tc>, window_params = [{transform_indices = @transform_0, window_bounds = array<i64: 256, 256>}, {transform_indices = @transform_1, window_bounds = array<i64: 384, 256>}, {transform_indices = @transform_2, window_bounds = array<i64: 256, 384>}]} {
    %c0_i32 = arith.constant 0 : i32
    %0 = arith.cmpi eq, %arg2, %c0_i32 : i32
    %1 = arith.extui %0 : i1 to i32
    %c0_i32_0 = arith.constant 0 : i32
    %2 = arith.cmpi ne, %1, %c0_i32_0 : i32
    scf.if %2 {
      %cst_10 = arith.constant 0.000000e+00 : f32
      %12 = vector.broadcast %cst_10 : f32 to vector<256x384xf32>
      %c0_11 = arith.constant 0 : index
      %c0_12 = arith.constant 0 : index
      %13 = vector.load %arg6[%c0_11, %c0_12] : memref<256x384xf32, #tpu.memory_space<vmem>>, vector<256x384xf32>
      tpu.vector_store %arg6[%c0_11, %c0_12], %12 {strides = array<i32>} : memref<256x384xf32, #tpu.memory_space<vmem>>, vector<256x384xf32>,
    } else {
    }
    %c0 = arith.constant 0 : index
    %c0_1 = arith.constant 0 : index
    %3 = vector.load %arg6[%c0, %c0_1] : memref<256x384xf32, #tpu.memory_space<vmem>>, vector<256x384xf32>
    %c0_2 = arith.constant 0 : index
    %c0_3 = arith.constant 0 : index
    %4 = vector.load %arg3[%c0_2, %c0_3] : memref<256x256xf32, #tpu.memory_space<vmem>>, vector<256x256xf32>
    %c0_4 = arith.constant 0 : index
    %c0_5 = arith.constant 0 : index
    %5 = vector.load %arg4[%c0_4, %c0_5] : memref<384x256xf32, #tpu.memory_space<vmem>>, vector<384x256xf32>
    %cst = arith.constant dense<0.000000e+00> : vector<256x384xf32>
    %6 = tpu.matmul %4, %5, %cst {dimension_numbers = #tpu.dot_dimension_numbers<[1], [1], [0], [0], [0, 0, 1, 0], [], []>} : vector<256x256xf32>, vector<384x256xf32>, vector<256x384xf32> -> vector<256x384xf32>
    %7 = arith.addf %3, %6 : vector<256x384xf32>
    %c0_6 = arith.constant 0 : index
    %c0_7 = arith.constant 0 : index
    %8 = vector.load %arg6[%c0_6, %c0_7] : memref<256x384xf32, #tpu.memory_space<vmem>>, vector<256x384xf32>
    tpu.vector_store %arg6[%c0_6, %c0_7], %7 {strides = array<i32>} : memref<256x384xf32, #tpu.memory_space<vmem>>, vector<256x384xf32>,
    %c0_i32_8 = arith.constant 0 : i32
    %9 = arith.cmpi eq, %arg2, %c0_i32_8 : i32
    %10 = arith.extui %9 : i1 to i32
    %c0_i32_9 = arith.constant 0 : i32
    %11 = arith.cmpi ne, %10, %c0_i32_9 : i32
    scf.if %11 {
      %c0_10 = arith.constant 0 : index
      %c0_11 = arith.constant 0 : index
      %12 = vector.load %arg6[%c0_10, %c0_11] : memref<256x384xf32, #tpu.memory_space<vmem>>, vector<256x384xf32>
      %c0_12 = arith.constant 0 : index
      %c0_13 = arith.constant 0 : index
      %13 = vector.load %arg5[%c0_12, %c0_13] : memref<256x384xf32, #tpu.memory_space<vmem>>, vector<256x384xf32>
      tpu.vector_store %arg5[%c0_12, %c0_13], %12 {strides = array<i32>} : memref<256x384xf32, #tpu.memory_space<vmem>>, vector<256x384xf32>,
    } else {
    }
    return
  }
  func.func @transform_0(%arg0: i32, %arg1: i32, %arg2: i32) -> (i32, i32) {
    %c0_i32 = arith.constant 0 : i32
    return %arg0, %arg2 : i32, i32
  }
  func.func @transform_1(%arg0: i32, %arg1: i32, %arg2: i32) -> (i32, i32) {
    %c0_i32 = arith.constant 0 : i32
    return %arg1, %arg2 : i32, i32
  }
  func.func @transform_2(%arg0: i32, %arg1: i32, %arg2: i32) -> (i32, i32) {
    %c0_i32 = arith.constant 0 : i32
    return %arg0, %arg1 : i32, i32
  }
}

</mosaic_0001>

<bundles_post_ra>
// kernel: tpu_custom_call.1
= control target key start
LH: loop header
LB: loop body
LE: loop exit
PB: predicated region body
PF: predicated region fallthrough
CT: control target
= control target key end

     0   :  { %s3071_s0 = inlined_call_operand.hbm [shape: f32[512,256], index: 0, kind: input, shape index: {}]   ;;  %s3072_s1 = inlined_call_operand.hbm [shape: f32[768,256], index: 1, kind: input, shape index: {}]   ;;  %s3073_s2 = inlined_call_operand.hbm [shape: f32[512,768], index: 2, kind: output, shape index: {}]  }
   0x1   :  { %3098 = sst [smem:[#allocation27_spill]] %s3071_s0 }
   0x2   :  { %3099 = sst [smem:[#allocation28_spill]] %s3073_s2 }
   0x3   :  { %7 = vsyncpa [#allocation4], 0 }
   0x4   :  { %9 = vsyncpa [#allocation4 + $0x1], 0 }
   0x5   :  { %10 = vsyncpa [#allocation7], 0 }
   0x6   :  { %12 = vsyncpa [#allocation7 + $0x1], 0 }
   0x7   :  { %13 = vsyncpa [#allocation5], 0 }
   0x8   :  { %15 = vsyncpa [#allocation5 + $0x1], 0  ;;  %s2228_s9 = smov 0   ;;  %s2230_s10 = smov 0  }
   0x9   :  { %s2232_s11 = smov 0   ;;  %s2234_s12 = smov 0  }
   0xa   :  { %s2236_s13 = smov 0   ;;  %s2238_s14 = smov 0  }
   0xb   :  { %s2240_s15 = smov 0   ;;  %s2242_s16 = smov 0  }
   0xc   :  { %s2244_s17 = smov 0   ;;  %s2246_s18 = smov 0  }
   0xd   :  { %s2248_s19 = smov 0   ;;  %s2250_s20 = smov 0  }
   0xe   :  { %s2252_s21 = smov 0   ;;  %s2254_s22 = smov 0  }
   0xf LB: > { %3100 = sst [smem:[#allocation12_spill]] %s2186_s17  ;;  %s1802_s23 = sadd.s32 4294967295, %s2206_s22   ;;  %s2206_s22 = sphi %s2254_s22, %s21_s22   ;;  %s2202_s21 = sphi %s2252_s21, %s3142_s21   ;;  %s2198_s20 = sphi %s2250_s20, %s3141_s20   ;;  %s2194_s19 = sphi %s2248_s19, %s3140_s19   ;;  %s2190_s18 = sphi %s2246_s18, %s3152_s18   ;;  %s2186_s17 = sphi %s2244_s17, %s3138_s17   ;;  %s2182_s16 = sphi %s2242_s16, %s3151_s16   ;;  %s2178_s15 = sphi %s2240_s15, %s3150_s15   ;;  %s2174_s14 = sphi %s2238_s14, %s3149_s14   ;;  %s2170_s13 = sphi %s2236_s13, %s3148_s13   ;;  %s2166_s12 = sphi %s2234_s12, %s3147_s12   ;;  %s2162_s11 = sphi %s2232_s11, %s3146_s11   ;;  %s2158_s10 = sphi %s2230_s10, %s3145_s10   ;;  %s2154_s9 = sphi %s2228_s9, %s3144_s9  }
  0x10   : > { %3101 = sst [smem:[#allocation13_spill]] %s2194_s19  ;;  %s40_s24 = sadd.s32 1, %s2202_s21 }
  0x11   : > { %3102 = sst [smem:[#allocation14_spill]] %s2198_s20  ;;  %s49_s25 = sadd.s32 1, %s2186_s17 }
  0x12   : > { %3103 = sst [smem:[#allocation15_spill]] %s2202_s21  ;;  %p56_p0 = scmp.ne.s32.totalorder %s2186_s17, %s2182_s16 }
  0x13   : > { %p57_p1 = scmp.eq.s32.totalorder %s2206_s22, 0  ;;  %p62_p2 = scmp.ne.s32.totalorder %s2182_s16, %s2178_s15 }
  0x14   : > { %p2303_p3 = scmp.eq.s32.totalorder %s1802_s23, 0  ;;  %p2307_p4 = scmp.eq.s32.totalorder %s1802_s23, 3 }
  0x15   : > { %p58_p5 = por %p57_p1, %p56_p0  ;;  %p1877_p7 = scmp.lt.s32.totalorder %s2206_s22, 4 }
  0x16   : > { %p2315_p6 = por %p2303_p3, %p62_p2  ;;  %s142_s29 = sand.u32 1, %s2186_s17  }
  0x17   : > { %s1820_s30 = sshll.u32 %s2202_s21, 9  ;;  %s1806_s3 = sshll.u32 %s142_s29, 9 }
  0x18   : > { %s3107_s0 = sld [smem:[#allocation27_spill]]  ;;  %s146_s8 = scalar_lea.vmem [#allocation3], %s1806_s3 }
  0x19   : > { %s157_s15 = sshll.u32 %s146_s8, 4  ;;  %p1867_p8 = pnand %p1877_p7, %p58_p5  ;;  %s158_s15 = int_to_ptr.vmem [resolvable:$true] %s157_s15 }
  0x1a   : > { %p1812_p9 = scmp.ge.s32.totalorder %s2206_s22, 1  ;;  %p190_p10 = scmp.lt.s32.totalorder %s2206_s22, 5 }
  0x1b   : > { %s143_s23 = scalar_lea.sflag [#allocation4], %s142_s29  ;;  %s3075_s4 = smov 16  }
  0x1c   : > { %p2332_p11 = pnand %p1812_p9, %p190_p10  ;;  %s1803_s5 = sadd.s32 4294967294, %s2206_s22  }
  0x1d   : > { %s77_s8 = sadd.s32 1, %s2174_s14  ;;  %p84_p13 = scmp.ne.s32.totalorder %s2174_s14, %s2170_s13 }
  0x1e   : > { %s154_s6 = scalar_lea.hbm %s3107_s0, %s1820_s30  ;;  %s3074_s30 = smov 256  }
  0x1f   : > { %s155_s7 = sshll.u32 %s154_s6, 4  ;;  %s36_s6 = sadd.s32 1, %s2198_s20  ;;  %s156_s7 = int_to_ptr.hbm [resolvable:$true] %s155_s7 }
  0x20   : > { %1869 = dma.hbm_to_vmem [thread:$0]  (!%p1867_p8), %s156_s7, 8192, %s158_s15, %s143_s23, %s3074_s30, %s3074_s30, %s3075_s4  }
  0x21   : > { %p38_p12 = scmp.ge.s32.totalorder %s36_s6, 2  ;;  %p90_p0 = scmp.ne.s32.totalorder %s2170_s13, %s2166_s12 }
  0x22   : > { %s105_s29 = sadd.s32 1, %s2162_s11  ;;  %p2353_p2 = por %p84_p13, %p57_p1 }
  0x23   : > { %s3154_s6 = smov (%p38_p12, %s36_s6), 0  ;;  %s3156_s24 = smov (!%p38_p12, %s40_s24), %s2202_s21 }
  0x24   : > { %3109 = sst [smem:[#allocation16_spill]] %s3154_s6  ;;  %s72_s7 = ssub.s32 %s2198_s20, %s3154_s6 }
  0x25   : > { %p42_p5 = scmp.ge.s32.totalorder %s3156_s24, 2  ;;  %p75_p8 = scmp.eq.s32.totalorder %s72_s7, 0 }
  0x26   : > { %p2359_p9 = por %p90_p0, %p2303_p3  ;;  %p115_p10 = scmp.ne.s32.totalorder %s2162_s11, %s2158_s10 }
  0x27   : > { %s3158_s24 = smov (%p42_p5, %s3156_s24), 0  ;;  %p121_p13 = scmp.ne.s32.totalorder %s2158_s10, %s2154_s9 }
  0x28   : > { %3112 = sst [smem:[#allocation17_spill]] %s3158_s24  ;;  %s44_s30 = ssub.s32 %s2202_s21, %s3158_s24 }
  0x29   : > { %s2368_s23 = scalar_select %p75_p8, %s2174_s14, %s77_s8  }
  0x2a   : > { %p2374_p1 = por %p2307_p4, %p115_p10  ;;  %p47_p12 = scmp.eq.s32.totalorder %s44_s30, 0 }
  0x2b   : > { %s102_s26 = sor.u32 %s72_s7, %s44_s30  ;;  %p122_p0 = scmp.eq.s32.totalorder %s1803_s5, 3 }
  0x2c   : > { %p103_p3 = scmp.eq.s32.totalorder %s102_s26, 0  ;;  %s167_s2 = sand.u32 1, %s2174_s14  }
  0x2d   : > { %s2383_s0 = scalar_select %p47_p12, %s2186_s17, %s49_s25  }
  0x2e   : > { %s2386_s6 = scalar_select %p103_p3, %s2162_s11, %s105_s29  }
  0x2f   : > { %3114 = sst [smem:[#allocation18_spill]] %s2383_s0  ;;  %s1856_s19 = smul.u32 768, %s167_s2 }
  0x30   : > { %p2389_p5 = por %p122_p0, %p121_p13  ;;  %s1823_s27 = smul.u32 768, %s2198_s20 }
  0x31   : > { %p1870_p4 = pnand %p1877_p7, %p2353_p2  ;;  %s171_s26 = scalar_lea.vmem [#allocation6], %s1856_s19 }
  0x32   : > { %s179_s7 = scalar_lea.hbm %s3072_s1, %s1823_s27  ;;  %s182_s25 = sshll.u32 %s171_s26, 4  ;;  %s183_s25 = int_to_ptr.vmem [resolvable:$true] %s182_s25 }
  0x33   : > { %s180_s21 = sshll.u32 %s179_s7, 4  ;;  %s168_s5 = scalar_lea.sflag [#allocation7], %s167_s2  ;;  %s181_s21 = int_to_ptr.hbm [resolvable:$true] %s180_s21 }
  0x34   : > { %s3116_s29 = smov 16   ;;  %s3117_s0 = smov 256  }
  0x35   : > { %1872 = dma.hbm_to_vmem [thread:$0]  (!%p1870_p4), %s181_s21, 12288, %s183_s25, %s168_s5, %s3117_s0, %s3117_s0, %s3116_s29  }
  0x36   : > { %194 = sbr.rel (%p2332_p11) target bundleno = 647 (0x287), region = 28 }
  0x3b   : > { %s196_s15 = sand.u32 1, %s2182_s16  }
  0x3c   : > { %s1813_s20 = sshll.u32 %s196_s15, 9  ;;  %s197_s17 = scalar_lea.sflag [#allocation4], %s196_s15 }
  0x3d   : > { %s2407_s24 = scalar_lea.vmem [#allocation3], %s1813_s20 }
  0x3e   : > { %2141 = dma.done.wait (%p2315_p6), %s197_s17, 8192  }
  0x3f   : > { %2143 = vsyncadd (%p2315_p6), %s197_s17, 4294959104  ;;  %s206_s2 = sand.u32 1, %s2170_s13  }
  0x40   : > { %s1857_s19 = smul.u32 768, %s206_s2  ;;  %s207_s0 = scalar_lea.sflag [#allocation7], %s206_s2 }
  0x42   : > { %s2414_s21 = scalar_lea.vmem [#allocation6], %s1857_s19 }
  0x43   : > { %2145 = dma.done.wait (%p2359_p9), %s207_s0, 12288  }
  0x44   : > { %2147 = vsyncadd (%p2359_p9), %s207_s0, 4294955008  ;;  %v533_v0 = vld [vmem:[%s2414_s21 + $0xf0] sm:$0xff]  ;;  %v534_v1 = vld [vmem:[%s2414_s21 + $0xf8] sm:$0xff]  ;;  %s234_s17 = sand.u32 1, %s2158_s10   ;;  %s3134_s3 = sld [smem:[#allocation13_spill]] }
  0x45   : > { %1824 = vmatpush.xpose.msra.mxu2 %v533_v0  ;;  %1840 = vmatpush.xpose.msra.mxu3 %v534_v1  ;;  %v531_v2 = vld [vmem:[%s2414_s21 + $0xe0] sm:$0xff]  ;;  %v532_v3 = vld [vmem:[%s2414_s21 + $0xe8] sm:$0xff]  ;;  %v529_v4 = vld [vmem:[%s2414_s21 + $0xd0] sm:$0xff]  ;;  %s1858_s20 = smul.u32 768, %s234_s17  ;;  %s3135_s25 = sld [smem:[#allocation28_spill]] }
  0x46   : > { %599 = vmatpush.xpose.msra.mxu0 %v533_v0  ;;  %712 = vmatpush.xpose.msra.mxu1 %v534_v1  ;;  %v530_v5 = vld [vmem:[%s2414_s21 + $0xd8] sm:$0xff]  ;;  %v527_v6 = vld [vmem:[%s2414_s21 + $0xc0] sm:$0xff]  ;;  %v528_v7 = vld [vmem:[%s2414_s21 + $0xc8] sm:$0xff]  ;;  %s1673_s12 = smul.u32 3, %s2190_s18 }
  0x47   : > { %v525_v8 = vld [vmem:[%s2414_s21 + $0xb0] sm:$0xff]  ;;  %v526_v9 = vld [vmem:[%s2414_s21 + $0xb8] sm:$0xff]  ;;  %v523_v10 = vld [vmem:[%s2414_s21 + $0xa0] sm:$0xff]  ;;  %s2777_s28 = scalar_lea.vmem [#allocation8], %s1858_s20 }
  0x48   : > { %v524_v11 = vld [vmem:[%s2414_s21 + $0xa8] sm:$0xff]  ;;  %v521_v12 = vld [vmem:[%s2414_s21 + $0x90] sm:$0xff]  ;;  %v522_v13 = vld [vmem:[%s2414_s21 + $0x98] sm:$0xff]  ;;  %s1680_s29 = sshll.u32 %s2777_s28, 4  ;;  %s1681_s29 = int_to_ptr.vmem [resolvable:$true] %s1680_s29 }
  0x49   : > { %1825 = vmatpush.xpose.msra.mxu2 %v531_v2  ;;  %1841 = vmatpush.xpose.msra.mxu3 %v532_v3  ;;  %v519_v14 = vld [vmem:[%s2414_s21 + $0x80] sm:$0xff]  ;;  %v520_v15 = vld [vmem:[%s2414_s21 + $0x88] sm:$0xff]  ;;  %v517_v16 = vld [vmem:[%s2414_s21 + $0x70] sm:$0xff] }
  0x4a   : > { %600 = vmatpush.xpose.msra.mxu0 %v531_v2  ;;  %713 = vmatpush.xpose.msra.mxu1 %v532_v3  ;;  %v518_v17 = vld [vmem:[%s2414_s21 + $0x78] sm:$0xff]  ;;  %v515_v18 = vld [vmem:[%s2414_s21 + $0x60] sm:$0xff]  ;;  %v516_v19 = vld [vmem:[%s2414_s21 + $0x68] sm:$0xff]  ;;  %s1859_s27 = smul.u32 192, %s3134_s3 }
  0x4b   : > { %v513_v20 = vld [vmem:[%s2414_s21 + $0x50] sm:$0xff]  ;;  %v514_v21 = vld [vmem:[%s2414_s21 + $0x58] sm:$0xff]  ;;  %v511_v22 = vld [vmem:[%s2414_s21 + $0x40] sm:$0xff]  ;;  %s2076_s20 = scalar_lea.hbm %s3135_s25, 3072 }
  0x4c   : > { %v512_v23 = vld [vmem:[%s2414_s21 + $0x48] sm:$0xff]  ;;  %v509_v24 = vld [vmem:[%s2414_s21 + $0x30] sm:$0xff]  ;;  %v510_v25 = vld [vmem:[%s2414_s21 + $0x38] sm:$0xff]  ;;  %s1677_s30 = sadd.s32 %s1859_s27, %s1673_s12 }
  0x4d   : > { %1826 = vmatpush.xpose.msra.mxu2 %v529_v4  ;;  %1842 = vmatpush.xpose.msra.mxu3 %v530_v5  ;;  %v507_v26 = vld [vmem:[%s2414_s21 + $0x20] sm:$0xff]  ;;  %v508_v27 = vld [vmem:[%s2414_s21 + $0x28] sm:$0xff]  ;;  %v505_v28 = vld [vmem:[%s2414_s21 + $0x10] sm:$0xff]  ;;  %s1816_s7 = sshll.u32 %s1677_s30, 3 }
  0x4e   : > { %601 = vmatpush.xpose.msra.mxu0 %v529_v4  ;;  %714 = vmatpush.xpose.msra.mxu1 %v530_v5  ;;  %v506_v29 = vld [vmem:[%s2414_s21 + $0x18] sm:$0xff]  ;;  %v503_v30 = vld [vmem:[%s2414_s21] sm:$0xff]  ;;  %v504_v31 = vld [vmem:[%s2414_s21 + $0x8] sm:$0xff]  ;;  %s1679_s5 = scalar_lea.hbm %s3135_s25, %s1816_s7 }
  0x4f   : > { %v565_v32 = vld [vmem:[%s2414_s21 + $0x1f0] sm:$0xff]  ;;  %v566_v33 = vld [vmem:[%s2414_s21 + $0x1f8] sm:$0xff]  ;;  %v2455_v34 = vld [vmem:[%s2407_s24 + $0x100] sm:$0xff]  ;;  %s1682_s15 = sshll.u32 %s1679_s5, 4  ;;  %s1683_s15 = int_to_ptr.hbm [resolvable:$true] %s1682_s15 }
  0x50   : > { %v2458_v35 = vld [vmem:[%s2407_s24 + $0x108] sm:$0xff]  ;;  %v597_v36 = vld [vmem:[%s2414_s21 + $0x2f0] sm:$0xff]  ;;  %v598_v37 = vld [vmem:[%s2414_s21 + $0x2f8] sm:$0xff]  ;;  %s2070_s2 = sshra.s32 %s1683_s15, 4  ;;  %s2071_s2 = int_to_ptr.hbm [resolvable:$true] %s2070_s2 }
  0x51   : > { %1827 = vmatpush.xpose.msra.mxu2 %v527_v6  ;;  %1843 = vmatpush.xpose.msra.mxu3 %v528_v7  ;;  %v2463_v38 = vld [vmem:[%s2407_s24] sm:$0xff]  ;;  %v2466_v39 = vld [vmem:[%s2407_s24 + $0x8] sm:$0xff]  ;;  %v561_v44 = vld [vmem:[%s2414_s21 + $0x1d0] sm:$0xff]  ;;  %s2072_s19 = scalar_lea.hbm %s2071_s2, 768  ;;  %p2077_p2 = scmp.lt.s32.totalorder %s2071_s2, %s3135_s25 }
  0x52   : > { %602 = vmatpush.xpose.msra.mxu0 %v527_v6  ;;  %715 = vmatpush.xpose.msra.mxu1 %v528_v7  ;;  %v563_v40 = vld [vmem:[%s2414_s21 + $0x1e0] sm:$0xff]  ;;  %v564_v41 = vld [vmem:[%s2414_s21 + $0x1e8] sm:$0xff]  ;;  %v562_v45 = vld [vmem:[%s2414_s21 + $0x1d8] sm:$0xff]  ;;  %p2073_p6 = scmp.ne.s32.totalorder %s2071_s2, %s2072_s19  ;;  %p2078_p8 = scmp.lt.s32.totalorder %s2076_s20, %s2072_s19 }
  0x53   : > { %v595_v42 = vld [vmem:[%s2414_s21 + $0x2e0] sm:$0xff]  ;;  %v596_v43 = vld [vmem:[%s2414_s21 + $0x2e8] sm:$0xff]  ;;  %v2479_v46 = vld [vmem:[%s2407_s24 + $0x110] sm:$0xff] }
  0x54   : > { %v2482_v47 = vld [vmem:[%s2407_s24 + $0x118] sm:$0xff]  ;;  %v593_v48 = vld [vmem:[%s2414_s21 + $0x2d0] sm:$0xff]  ;;  %v559_v52 = vld [vmem:[%s2414_s21 + $0x1c0] sm:$0xff]  ;;  %p2074_p7 = pnand %p2073_p6, %p2374_p1  ;;  %p2079_p9 = por %p2078_p8, %p2077_p2 }
  0x55   : > { %1828 = vmatpush.xpose.msra.mxu2 %v525_v8  ;;  %1844 = vmatpush.xpose.msra.mxu3 %v526_v9  ;;  %v594_v49 = vld [vmem:[%s2414_s21 + $0x2d8] sm:$0xff]  ;;  %v2487_v50 = vld [vmem:[%s2407_s24 + $0x10] sm:$0xff]  ;;  %v560_v53 = vld [vmem:[%s2414_s21 + $0x1c8] sm:$0xff] }
  0x56   : > { %603 = vmatpush.xpose.msra.mxu0 %v525_v8  ;;  %716 = vmatpush.xpose.msra.mxu1 %v526_v9  ;;  %v2490_v51 = vld [vmem:[%s2407_s24 + $0x18] sm:$0xff]  ;;  %v591_v54 = vld [vmem:[%s2414_s21 + $0x2c0] sm:$0xff]  ;;  %v592_v55 = vld [vmem:[%s2414_s21 + $0x2c8] sm:$0xff]  ;;  %p2075_p11 = pneg %p2074_p7 }
  0x57   : > { %v557_v56 = vld [vmem:[%s2414_s21 + $0x1b0] sm:$0xff]  ;;  %v558_v57 = vld [vmem:[%s2414_s21 + $0x1b8] sm:$0xff]  ;;  %v2503_v58 = vld [vmem:[%s2407_s24 + $0x120] sm:$0xff] }
  0x58   : > { %v2506_v59 = vld [vmem:[%s2407_s24 + $0x128] sm:$0xff]  ;;  %v589_v60 = vld [vmem:[%s2414_s21 + $0x2b0] sm:$0xff]  ;;  %v590_v61 = vld [vmem:[%s2414_s21 + $0x2b8] sm:$0xff]  ;;  %p2080_p10 = pnand %p2079_p9, %p2075_p11 }
  0x59   : > { %1829 = vmatpush.xpose.msra.mxu2 %v523_v10  ;;  %1845 = vmatpush.xpose.msra.mxu3 %v524_v11  ;;  %v2511_v62 = vld [vmem:[%s2407_s24 + $0x20] sm:$0xff]  ;;  %v2514_v63 = vld [vmem:[%s2407_s24 + $0x28] sm:$0xff]  ;;  %v553_v4 = vld [vmem:[%s2414_s21 + $0x190] sm:$0xff] }
  0x5a   : > { %604 = vmatpush.xpose.msra.mxu0 %v523_v10  ;;  %717 = vmatpush.xpose.msra.mxu1 %v524_v11  ;;  %v555_v0 = vld [vmem:[%s2414_s21 + $0x1a0] sm:$0xff]  ;;  %v556_v1 = vld [vmem:[%s2414_s21 + $0x1a8] sm:$0xff]  ;;  %v554_v5 = vld [vmem:[%s2414_s21 + $0x198] sm:$0xff] }
  0x5b   : > { %v587_v2 = vld [vmem:[%s2414_s21 + $0x2a0] sm:$0xff]  ;;  %v588_v3 = vld [vmem:[%s2414_s21 + $0x2a8] sm:$0xff]  ;;  %v2527_v6 = vld [vmem:[%s2407_s24 + $0x130] sm:$0xff] }
  0x5c   : > { %v2530_v7 = vld [vmem:[%s2407_s24 + $0x138] sm:$0xff]  ;;  %v585_v8 = vld [vmem:[%s2414_s21 + $0x290] sm:$0xff] }
  0x5d   : > { %1830 = vmatpush.xpose.msra.mxu2 %v521_v12  ;;  %1846 = vmatpush.xpose.msra.mxu3 %v522_v13  ;;  %v586_v9 = vld [vmem:[%s2414_s21 + $0x298] sm:$0xff]  ;;  %v2535_v10 = vld [vmem:[%s2407_s24 + $0x30] sm:$0xff] }
  0x5e   : > { %605 = vmatpush.xpose.msra.mxu0 %v521_v12  ;;  %718 = vmatpush.xpose.msra.mxu1 %v522_v13  ;;  %v2538_v11 = vld [vmem:[%s2407_s24 + $0x38] sm:$0xff]  ;;  %v551_v12 = vld [vmem:[%s2414_s21 + $0x180] sm:$0xff]  ;;  %v552_v13 = vld [vmem:[%s2414_s21 + $0x188] sm:$0xff] }
  0x61   : > { %1831 = vmatpush.xpose.msra.mxu2 %v519_v14  ;;  %1847 = vmatpush.xpose.msra.mxu3 %v520_v15 }
  0x62   : > { %606 = vmatpush.xpose.msra.mxu0 %v519_v14  ;;  %719 = vmatpush.xpose.msra.mxu1 %v520_v15  ;;  %v583_v14 = vld [vmem:[%s2414_s21 + $0x280] sm:$0xff]  ;;  %v584_v15 = vld [vmem:[%s2414_s21 + $0x288] sm:$0xff] }
  0x65   : > { %1832 = vmatpush.xpose.msra.mxu2 %v517_v16  ;;  %1848 = vmatpush.xpose.msra.mxu3 %v518_v17 }
  0x66   : > { %607 = vmatpush.xpose.msra.mxu0 %v517_v16  ;;  %720 = vmatpush.xpose.msra.mxu1 %v518_v17  ;;  %v2549_v16 = vld [vmem:[%s2407_s24 + $0x140] sm:$0xff]  ;;  %v2552_v17 = vld [vmem:[%s2407_s24 + $0x148] sm:$0xff] }
  0x69   : > { %1833 = vmatpush.xpose.msra.mxu2 %v515_v18  ;;  %1849 = vmatpush.xpose.msra.mxu3 %v516_v19 }
  0x6a   : > { %608 = vmatpush.xpose.msra.mxu0 %v515_v18  ;;  %721 = vmatpush.xpose.msra.mxu1 %v516_v19  ;;  %v2555_v18 = vld [vmem:[%s2407_s24 + $0x40] sm:$0xff]  ;;  %v2558_v19 = vld [vmem:[%s2407_s24 + $0x48] sm:$0xff] }
  0x6d   : > { %1834 = vmatpush.xpose.msra.mxu2 %v513_v20  ;;  %1850 = vmatpush.xpose.msra.mxu3 %v514_v21 }
  0x6e   : > { %609 = vmatpush.xpose.msra.mxu0 %v513_v20  ;;  %722 = vmatpush.xpose.msra.mxu1 %v514_v21  ;;  %v549_v20 = vld [vmem:[%s2414_s21 + $0x170] sm:$0xff]  ;;  %v550_v21 = vld [vmem:[%s2414_s21 + $0x178] sm:$0xff] }
  0x71   : > { %1835 = vmatpush.xpose.msra.mxu2 %v511_v22  ;;  %1851 = vmatpush.xpose.msra.mxu3 %v512_v23 }
  0x72   : > { %610 = vmatpush.xpose.msra.mxu0 %v511_v22  ;;  %723 = vmatpush.xpose.msra.mxu1 %v512_v23  ;;  %v581_v22 = vld [vmem:[%s2414_s21 + $0x270] sm:$0xff]  ;;  %v582_v23 = vld [vmem:[%s2414_s21 + $0x278] sm:$0xff] }
  0x75   : > { %1836 = vmatpush.xpose.msra.mxu2 %v509_v24  ;;  %1852 = vmatpush.xpose.msra.mxu3 %v510_v25 }
  0x76   : > { %611 = vmatpush.xpose.msra.mxu0 %v509_v24  ;;  %724 = vmatpush.xpose.msra.mxu1 %v510_v25  ;;  %v2569_v24 = vld [vmem:[%s2407_s24 + $0x150] sm:$0xff]  ;;  %v2572_v25 = vld [vmem:[%s2407_s24 + $0x158] sm:$0xff] }
  0x79   : > { %1837 = vmatpush.xpose.msra.mxu2 %v507_v26  ;;  %1853 = vmatpush.xpose.msra.mxu3 %v508_v27 }
  0x7a   : > { %612 = vmatpush.xpose.msra.mxu0 %v507_v26  ;;  %725 = vmatpush.xpose.msra.mxu1 %v508_v27  ;;  %v2575_v26 = vld [vmem:[%s2407_s24 + $0x50] sm:$0xff]  ;;  %v2578_v27 = vld [vmem:[%s2407_s24 + $0x58] sm:$0xff] }
  0x7d   : > { %1838 = vmatpush.xpose.msra.mxu2 %v505_v28  ;;  %1854 = vmatpush.xpose.msra.mxu3 %v506_v29 }
  0x7e   : > { %613 = vmatpush.xpose.msra.mxu0 %v505_v28  ;;  %726 = vmatpush.xpose.msra.mxu1 %v506_v29  ;;  %v547_v28 = vld [vmem:[%s2414_s21 + $0x160] sm:$0xff]  ;;  %v548_v29 = vld [vmem:[%s2414_s21 + $0x168] sm:$0xff] }
  0x81   : > { %1839 = vmatpush.xpose.msra.mxu2 %v503_v30  ;;  %1855 = vmatpush.xpose.msra.mxu3 %v504_v31 }
  0x82   : > { %614 = vmatpush.xpose.msra.mxu0 %v503_v30  ;;  %727 = vmatpush.xpose.msra.mxu1 %v504_v31  ;;  %v579_v30 = vld [vmem:[%s2414_s21 + $0x260] sm:$0xff]  ;;  %v580_v31 = vld [vmem:[%s2414_s21 + $0x268] sm:$0xff] }
  0x84   : > { %663 = vmatmul.f32.vlgmr.msra.gmra.mxu2 %v2455_v34  ;;  %776 = vmatmul.f32.vlgmr.msra.gmra.mxu3 %v2458_v35 }
  0x85   : > { %825 = vmatpush.xpose.msrb.mxu2 %v565_v32  ;;  %938 = vmatpush.xpose.msrb.mxu3 %v566_v33  ;;  %v2589_v32 = vld [vmem:[%s2407_s24 + $0x160] sm:$0xff]  ;;  %v2592_v33 = vld [vmem:[%s2407_s24 + $0x168] sm:$0xff] }
  0x86   : > { %1051 = vmatpush.xpose.msrb.mxu0 %v597_v36  ;;  %1164 = vmatpush.xpose.msrb.mxu1 %v598_v37  ;;  %v2595_v36 = vld [vmem:[%s2407_s24 + $0x60] sm:$0xff]  ;;  %v2598_v37 = vld [vmem:[%s2407_s24 + $0x68] sm:$0xff] }
  0x87   : > { %615 = vmatmul.f32.vlgmr.msra.gmra.mxu0 %v2463_v38  ;;  %728 = vmatmul.f32.vlgmr.msra.gmra.mxu1 %v2466_v39 }
  0x89   : > { %826 = vmatpush.xpose.msrb.mxu2 %v563_v40  ;;  %939 = vmatpush.xpose.msrb.mxu3 %v564_v41  ;;  %v545_v40 = vld [vmem:[%s2414_s21 + $0x150] sm:$0xff]  ;;  %v546_v41 = vld [vmem:[%s2414_s21 + $0x158] sm:$0xff] }
  0x8a   : > { %1052 = vmatpush.xpose.msrb.mxu0 %v595_v42  ;;  %1165 = vmatpush.xpose.msrb.mxu1 %v596_v43  ;;  %v577_v42 = vld [vmem:[%s2414_s21 + $0x250] sm:$0xff]  ;;  %v578_v43 = vld [vmem:[%s2414_s21 + $0x258] sm:$0xff] }
  0x8c   : > { %666 = vmatmul.f32.gmra.mxu2 %v2479_v46  ;;  %779 = vmatmul.f32.gmra.mxu3 %v2482_v47 }
  0x8d   : > { %827 = vmatpush.xpose.msrb.mxu2 %v561_v44  ;;  %940 = vmatpush.xpose.msrb.mxu3 %v562_v45  ;;  %v2609_v44 = vld [vmem:[%s2407_s24 + $0x170] sm:$0xff]  ;;  %v2612_v45 = vld [vmem:[%s2407_s24 + $0x178] sm:$0xff] }
  0x8e   : > { %1053 = vmatpush.xpose.msrb.mxu0 %v593_v48  ;;  %1166 = vmatpush.xpose.msrb.mxu1 %v594_v49  ;;  %v2615_v48 = vld [vmem:[%s2407_s24 + $0x70] sm:$0xff]  ;;  %v2618_v49 = vld [vmem:[%s2407_s24 + $0x78] sm:$0xff] }
  0x8f   : > { %618 = vmatmul.f32.gmra.mxu0 %v2487_v50  ;;  %731 = vmatmul.f32.gmra.mxu1 %v2490_v51 }
  0x91   : > { %828 = vmatpush.xpose.msrb.mxu2 %v559_v52  ;;  %941 = vmatpush.xpose.msrb.mxu3 %v560_v53  ;;  %v543_v52 = vld [vmem:[%s2414_s21 + $0x140] sm:$0xff]  ;;  %v544_v53 = vld [vmem:[%s2414_s21 + $0x148] sm:$0xff] }
  0x92   : > { %1054 = vmatpush.xpose.msrb.mxu0 %v591_v54  ;;  %1167 = vmatpush.xpose.msrb.mxu1 %v592_v55  ;;  %v575_v54 = vld [vmem:[%s2414_s21 + $0x240] sm:$0xff]  ;;  %v576_v55 = vld [vmem:[%s2414_s21 + $0x248] sm:$0xff] }
  0x94   : > { %669 = vmatmul.f32.gmra.mxu2 %v2503_v58  ;;  %782 = vmatmul.f32.gmra.mxu3 %v2506_v59 }
  0x95   : > { %829 = vmatpush.xpose.msrb.mxu2 %v557_v56  ;;  %942 = vmatpush.xpose.msrb.mxu3 %v558_v57  ;;  %v2629_v56 = vld [vmem:[%s2407_s24 + $0x180] sm:$0xff]  ;;  %v2632_v57 = vld [vmem:[%s2407_s24 + $0x188] sm:$0xff] }
  0x96   : > { %1055 = vmatpush.xpose.msrb.mxu0 %v589_v60  ;;  %1168 = vmatpush.xpose.msrb.mxu1 %v590_v61  ;;  %v2635_v60 = vld [vmem:[%s2407_s24 + $0x80] sm:$0xff]  ;;  %v2638_v61 = vld [vmem:[%s2407_s24 + $0x88] sm:$0xff] }
  0x97   : > { %621 = vmatmul.f32.gmra.mxu0 %v2511_v62  ;;  %734 = vmatmul.f32.gmra.mxu1 %v2514_v63 }
  0x99   : > { %830 = vmatpush.xpose.msrb.mxu2 %v555_v0  ;;  %943 = vmatpush.xpose.msrb.mxu3 %v556_v1  ;;  %v541_v0 = vld [vmem:[%s2414_s21 + $0x130] sm:$0xff]  ;;  %v542_v1 = vld [vmem:[%s2414_s21 + $0x138] sm:$0xff] }
  0x9a   : > { %1056 = vmatpush.xpose.msrb.mxu0 %v587_v2  ;;  %1169 = vmatpush.xpose.msrb.mxu1 %v588_v3  ;;  %v573_v2 = vld [vmem:[%s2414_s21 + $0x230] sm:$0xff]  ;;  %v574_v3 = vld [vmem:[%s2414_s21 + $0x238] sm:$0xff] }
  0x9c   : > { %672 = vmatmul.f32.gmra.mxu2 %v2527_v6  ;;  %785 = vmatmul.f32.gmra.mxu3 %v2530_v7 }
  0x9d   : > { %831 = vmatpush.xpose.msrb.mxu2 %v553_v4  ;;  %944 = vmatpush.xpose.msrb.mxu3 %v554_v5  ;;  %v2649_v4 = vld [vmem:[%s2407_s24 + $0x190] sm:$0xff]  ;;  %v2652_v5 = vld [vmem:[%s2407_s24 + $0x198] sm:$0xff] }
  0x9e   : > { %1057 = vmatpush.xpose.msrb.mxu0 %v585_v8  ;;  %1170 = vmatpush.xpose.msrb.mxu1 %v586_v9  ;;  %v2655_v8 = vld [vmem:[%s2407_s24 + $0x90] sm:$0xff]  ;;  %v2658_v9 = vld [vmem:[%s2407_s24 + $0x98] sm:$0xff] }
  0x9f   : > { %624 = vmatmul.f32.gmra.mxu0 %v2535_v10  ;;  %737 = vmatmul.f32.gmra.mxu1 %v2538_v11 }
  0xa1   : > { %832 = vmatpush.xpose.msrb.mxu2 %v551_v12  ;;  %945 = vmatpush.xpose.msrb.mxu3 %v552_v13  ;;  %v539_v12 = vld [vmem:[%s2414_s21 + $0x120] sm:$0xff]  ;;  %v540_v13 = vld [vmem:[%s2414_s21 + $0x128] sm:$0xff] }
  0xa2   : > { %1058 = vmatpush.xpose.msrb.mxu0 %v583_v14  ;;  %1171 = vmatpush.xpose.msrb.mxu1 %v584_v15  ;;  %v571_v14 = vld [vmem:[%s2414_s21 + $0x220] sm:$0xff]  ;;  %v572_v15 = vld [vmem:[%s2414_s21 + $0x228] sm:$0xff] }
  0xa4   : > { %675 = vmatmul.f32.gmra.mxu2 %v2549_v16  ;;  %788 = vmatmul.f32.gmra.mxu3 %v2552_v17 }
  0xa5   : > { %833 = vmatpush.xpose.msrb.mxu2 %v549_v20  ;;  %946 = vmatpush.xpose.msrb.mxu3 %v550_v21  ;;  %v2669_v20 = vld [vmem:[%s2407_s24 + $0x1a0] sm:$0xff]  ;;  %v2672_v21 = vld [vmem:[%s2407_s24 + $0x1a8] sm:$0xff] }
  0xa6   : > { %1059 = vmatpush.xpose.msrb.mxu0 %v581_v22  ;;  %1172 = vmatpush.xpose.msrb.mxu1 %v582_v23  ;;  %v2675_v22 = vld [vmem:[%s2407_s24 + $0xa0] sm:$0xff]  ;;  %v2678_v23 = vld [vmem:[%s2407_s24 + $0xa8] sm:$0xff] }
  0xa7   : > { %627 = vmatmul.f32.gmra.mxu0 %v2555_v18  ;;  %740 = vmatmul.f32.gmra.mxu1 %v2558_v19 }
  0xa9   : > { %834 = vmatpush.xpose.msrb.mxu2 %v547_v28  ;;  %947 = vmatpush.xpose.msrb.mxu3 %v548_v29  ;;  %v537_v28 = vld [vmem:[%s2414_s21 + $0x110] sm:$0xff]  ;;  %v538_v29 = vld [vmem:[%s2414_s21 + $0x118] sm:$0xff] }
  0xaa   : > { %1060 = vmatpush.xpose.msrb.mxu0 %v579_v30  ;;  %1173 = vmatpush.xpose.msrb.mxu1 %v580_v31  ;;  %v569_v30 = vld [vmem:[%s2414_s21 + $0x210] sm:$0xff]  ;;  %v570_v31 = vld [vmem:[%s2414_s21 + $0x218] sm:$0xff] }
  0xac   : > { %678 = vmatmul.f32.gmra.mxu2 %v2569_v24  ;;  %791 = vmatmul.f32.gmra.mxu3 %v2572_v25 }
  0xad   : > { %835 = vmatpush.xpose.msrb.mxu2 %v545_v40  ;;  %948 = vmatpush.xpose.msrb.mxu3 %v546_v41  ;;  %v2689_v40 = vld [vmem:[%s2407_s24 + $0x1b0] sm:$0xff]  ;;  %v2692_v41 = vld [vmem:[%s2407_s24 + $0x1b8] sm:$0xff] }
  0xae   : > { %1061 = vmatpush.xpose.msrb.mxu0 %v577_v42  ;;  %1174 = vmatpush.xpose.msrb.mxu1 %v578_v43  ;;  %v2695_v42 = vld [vmem:[%s2407_s24 + $0xb0] sm:$0xff]  ;;  %v2698_v43 = vld [vmem:[%s2407_s24 + $0xb8] sm:$0xff] }
  0xaf   : > { %630 = vmatmul.f32.gmra.mxu0 %v2575_v26  ;;  %743 = vmatmul.f32.gmra.mxu1 %v2578_v27 }
  0xb1   : > { %836 = vmatpush.xpose.msrb.mxu2 %v543_v52  ;;  %949 = vmatpush.xpose.msrb.mxu3 %v544_v53  ;;  %v535_v52 = vld [vmem:[%s2414_s21 + $0x100] sm:$0xff]  ;;  %v536_v53 = vld [vmem:[%s2414_s21 + $0x108] sm:$0xff] }
  0xb2   : > { %1062 = vmatpush.xpose.msrb.mxu0 %v575_v54  ;;  %1175 = vmatpush.xpose.msrb.mxu1 %v576_v55  ;;  %v567_v54 = vld [vmem:[%s2414_s21 + $0x200] sm:$0xff]  ;;  %v568_v55 = vld [vmem:[%s2414_s21 + $0x208] sm:$0xff] }
  0xb4   : > { %681 = vmatmul.f32.gmra.mxu2 %v2589_v32  ;;  %794 = vmatmul.f32.gmra.mxu3 %v2592_v33 }
  0xb5   : > { %837 = vmatpush.xpose.msrb.mxu2 %v541_v0  ;;  %950 = vmatpush.xpose.msrb.mxu3 %v542_v1  ;;  %v2709_v0 = vld [vmem:[%s2407_s24 + $0x1c0] sm:$0xff]  ;;  %v2712_v1 = vld [vmem:[%s2407_s24 + $0x1c8] sm:$0xff] }
  0xb6   : > { %1063 = vmatpush.xpose.msrb.mxu0 %v573_v2  ;;  %1176 = vmatpush.xpose.msrb.mxu1 %v574_v3  ;;  %3118 = vst [vmem:[#allocation19_spill] sm:$0xff] %v2709_v0  ;;  %v2715_v2 = vld [vmem:[%s2407_s24 + $0xc0] sm:$0xff]  ;;  %v2718_v3 = vld [vmem:[%s2407_s24 + $0xc8] sm:$0xff] }
  0xb7   : > { %633 = vmatmul.f32.gmra.mxu0 %v2595_v36  ;;  %746 = vmatmul.f32.gmra.mxu1 %v2598_v37  ;;  %3119 = vst [vmem:[#allocation20_spill] sm:$0xff] %v2712_v1 }
  0xb9   : > { %838 = vmatpush.xpose.msrb.mxu2 %v539_v12  ;;  %951 = vmatpush.xpose.msrb.mxu3 %v540_v13  ;;  %v2725_v12 = vld [vmem:[%s2407_s24 + $0x1d0] sm:$0xff]  ;;  %v2728_v13 = vld [vmem:[%s2407_s24 + $0x1d8] sm:$0xff] }
  0xba   : > { %1064 = vmatpush.xpose.msrb.mxu0 %v571_v14  ;;  %1177 = vmatpush.xpose.msrb.mxu1 %v572_v15  ;;  %3120 = vst [vmem:[#allocation21_spill] sm:$0xff] %v2725_v12  ;;  %v2731_v14 = vld [vmem:[%s2407_s24 + $0xd0] sm:$0xff]  ;;  %v2734_v15 = vld [vmem:[%s2407_s24 + $0xd8] sm:$0xff] }
  0xbb   : > { %3121 = vst [vmem:[#allocation22_spill] sm:$0xff] %v2728_v13 }
  0xbc   : > { %684 = vmatmul.f32.gmra.mxu2 %v2609_v44  ;;  %797 = vmatmul.f32.gmra.mxu3 %v2612_v45 }
  0xbd   : > { %839 = vmatpush.xpose.msrb.mxu2 %v537_v28  ;;  %952 = vmatpush.xpose.msrb.mxu3 %v538_v29  ;;  %v2741_v28 = vld [vmem:[%s2407_s24 + $0x1e0] sm:$0xff]  ;;  %v2744_v29 = vld [vmem:[%s2407_s24 + $0x1e8] sm:$0xff] }
  0xbe   : > { %1065 = vmatpush.xpose.msrb.mxu0 %v569_v30  ;;  %1178 = vmatpush.xpose.msrb.mxu1 %v570_v31  ;;  %3122 = vst [vmem:[#allocation23_spill] sm:$0xff] %v2741_v28  ;;  %v2747_v30 = vld [vmem:[%s2407_s24 + $0xe0] sm:$0xff]  ;;  %v2750_v31 = vld [vmem:[%s2407_s24 + $0xe8] sm:$0xff] }
  0xbf   : > { %636 = vmatmul.f32.gmra.mxu0 %v2615_v48  ;;  %749 = vmatmul.f32.gmra.mxu1 %v2618_v49  ;;  %3123 = vst [vmem:[#allocation24_spill] sm:$0xff] %v2744_v29 }
  0xc1   : > { %840 = vmatpush.xpose.msrb.mxu2 %v535_v52  ;;  %953 = vmatpush.xpose.msrb.mxu3 %v536_v53  ;;  %v2757_v52 = vld [vmem:[%s2407_s24 + $0x1f0] sm:$0xff]  ;;  %v2760_v53 = vld [vmem:[%s2407_s24 + $0x1f8] sm:$0xff] }
  0xc2   : > { %1066 = vmatpush.xpose.msrb.mxu0 %v567_v54  ;;  %1179 = vmatpush.xpose.msrb.mxu1 %v568_v55  ;;  %3124 = vst [vmem:[#allocation25_spill] sm:$0xff] %v2757_v52  ;;  %v2763_v54 = vld [vmem:[%s2407_s24 + $0xf0] sm:$0xff]  ;;  %v2766_v55 = vld [vmem:[%s2407_s24 + $0xf8] sm:$0xff]  ;;  %s1665_s24 = scalar_lea.sflag [#allocation5], %s234_s17 }
  0xc3   : > { %3125 = vst [vmem:[#allocation26_spill] sm:$0xff] %v2760_v53 }
  0xc4   : > { %687 = vmatmul.f32.gmra.mxu2 %v2629_v56  ;;  %800 = vmatmul.f32.gmra.mxu3 %v2632_v57 }
  0xc7   : > { %639 = vmatmul.f32.gmra.mxu0 %v2635_v60  ;;  %752 = vmatmul.f32.gmra.mxu1 %v2638_v61 }
  0xcc   : > { %690 = vmatmul.f32.gmra.mxu2 %v2649_v4  ;;  %803 = vmatmul.f32.gmra.mxu3 %v2652_v5 }
  0xcf   : > { %642 = vmatmul.f32.gmra.mxu0 %v2655_v8  ;;  %755 = vmatmul.f32.gmra.mxu1 %v2658_v9 }
  0xd4   : > { %693 = vmatmul.f32.gmra.mxu2 %v2669_v20  ;;  %806 = vmatmul.f32.gmra.mxu3 %v2672_v21 }
  0xd7   : > { %645 = vmatmul.f32.gmra.mxu0 %v2675_v22  ;;  %758 = vmatmul.f32.gmra.mxu1 %v2678_v23 }
  0xdc   : > { %696 = vmatmul.f32.gmra.mxu2 %v2689_v40  ;;  %809 = vmatmul.f32.gmra.mxu3 %v2692_v41 }
  0xdf   : > { %648 = vmatmul.f32.gmra.mxu0 %v2695_v42  ;;  %761 = vmatmul.f32.gmra.mxu1 %v2698_v43 }
  0xe4   : > { %699 = vmatmul.f32.gmra.mxu2 %v2709_v0  ;;  %812 = vmatmul.f32.gmra.mxu3 %v2712_v1 }
  0xe7   : > { %651 = vmatmul.f32.gmra.mxu0 %v2715_v2  ;;  %764 = vmatmul.f32.gmra.mxu1 %v2718_v3 }
  0xec   : > { %702 = vmatmul.f32.gmra.mxu2 %v2725_v12  ;;  %815 = vmatmul.f32.gmra.mxu3 %v2728_v13 }
  0xef   : > { %654 = vmatmul.f32.gmra.mxu0 %v2731_v14  ;;  %767 = vmatmul.f32.gmra.mxu1 %v2734_v15 }
  0xf4   : > { %705 = vmatmul.f32.gmra.mxu2 %v2741_v28  ;;  %818 = vmatmul.f32.gmra.mxu3 %v2744_v29 }
  0xf7   : > { %657 = vmatmul.f32.gmra.mxu0 %v2747_v30  ;;  %770 = vmatmul.f32.gmra.mxu1 %v2750_v31 }
  0xfc   : > { %708 = vmatmul.f32.gmra.mxu2 %v2757_v52  ;;  %821 = vmatmul.f32.gmra.mxu3 %v2760_v53 }
  0xff   : > { %660 = vmatmul.f32.gmra.mxu0 %v2763_v54  ;;  %773 = vmatmul.f32.gmra.mxu1 %v2766_v55 }
 0x104   : > { %v616_v29 = vpop.f32.mrf.mxu0  ;;  %v729_v28 = vpop.f32.mrf.mxu1  ;;  %841 = vmatmul.f32.vlgmr.msrb.gmra.mxu2 %v2463_v38  ;;  %954 = vmatmul.f32.vlgmr.msrb.gmra.mxu3 %v2466_v39 }
 0x105   : > { %v730_v13 = vadd.f32 %v729_v28, %v616_v29 }
 0x107   : > { %1568 = vst [vmem:[%s2777_s28] sm:$0xff] %v730_v13  ;;  %1067 = vmatmul.f32.vlgmr.msrb.gmra.mxu0 %v2463_v38  ;;  %1180 = vmatmul.f32.vlgmr.msrb.gmra.mxu1 %v2466_v39  ;;  %v664_v53 = vpop.f32.mrf.mxu2  ;;  %v777_v52 = vpop.f32.mrf.mxu3 }
 0x108   : > { %v778_v12 = vadd.f32 %v777_v52, %v664_v53 }
 0x10a   : > { %1616 = vst [vmem:[%s2777_s28 + $0x180] sm:$0xff] %v778_v12 }
 0x10c   : > { %v619_v1 = vpop.f32.mrf.mxu0  ;;  %v732_v0 = vpop.f32.mrf.mxu1  ;;  %844 = vmatmul.f32.gmra.mxu2 %v2487_v50  ;;  %957 = vmatmul.f32.gmra.mxu3 %v2490_v51 }
 0x10d   : > { %v733_v28 = vadd.f32 %v732_v0, %v619_v1 }
 0x10f   : > { %1571 = vst [vmem:[%s2777_s28 + $0x18] sm:$0xff] %v733_v28  ;;  %1070 = vmatmul.f32.gmra.mxu0 %v2487_v50  ;;  %1183 = vmatmul.f32.gmra.mxu1 %v2490_v51  ;;  %v667_v38 = vpop.f32.mrf.mxu2  ;;  %v780_v39 = vpop.f32.mrf.mxu3 }
 0x110   : > { %v781_v13 = vadd.f32 %v780_v39, %v667_v38 }
 0x112   : > { %1619 = vst [vmem:[%s2777_s28 + $0x198] sm:$0xff] %v781_v13 }
 0x114   : > { %v622_v29 = vpop.f32.mrf.mxu0  ;;  %v735_v12 = vpop.f32.mrf.mxu1  ;;  %847 = vmatmul.f32.gmra.mxu2 %v2511_v62  ;;  %960 = vmatmul.f32.gmra.mxu3 %v2514_v63 }
 0x115   : > { %v736_v52 = vadd.f32 %v735_v12, %v622_v29 }
 0x117   : > { %1574 = vst [vmem:[%s2777_s28 + $0x30] sm:$0xff] %v736_v52  ;;  %1073 = vmatmul.f32.gmra.mxu0 %v2511_v62  ;;  %1186 = vmatmul.f32.gmra.mxu1 %v2514_v63  ;;  %v670_v50 = vpop.f32.mrf.mxu2  ;;  %v783_v51 = vpop.f32.mrf.mxu3 }
 0x118   : > { %v784_v0 = vadd.f32 %v783_v51, %v670_v50 }
 0x11a   : > { %1622 = vst [vmem:[%s2777_s28 + $0x1b0] sm:$0xff] %v784_v0 }
 0x11c   : > { %v625_v1 = vpop.f32.mrf.mxu0  ;;  %v738_v53 = vpop.f32.mrf.mxu1  ;;  %850 = vmatmul.f32.gmra.mxu2 %v2535_v10  ;;  %963 = vmatmul.f32.gmra.mxu3 %v2538_v11 }
 0x11d   : > { %v739_v28 = vadd.f32 %v738_v53, %v625_v1 }
 0x11f   : > { %1577 = vst [vmem:[%s2777_s28 + $0x48] sm:$0xff] %v739_v28  ;;  %1076 = vmatmul.f32.gmra.mxu0 %v2535_v10  ;;  %1189 = vmatmul.f32.gmra.mxu1 %v2538_v11  ;;  %v673_v62 = vpop.f32.mrf.mxu2  ;;  %v786_v63 = vpop.f32.mrf.mxu3 }
 0x120   : > { %v787_v38 = vadd.f32 %v786_v63, %v673_v62 }
 0x122   : > { %1625 = vst [vmem:[%s2777_s28 + $0x1c8] sm:$0xff] %v787_v38 }
 0x124   : > { %v628_v39 = vpop.f32.mrf.mxu0  ;;  %v741_v13 = vpop.f32.mrf.mxu1  ;;  %853 = vmatmul.f32.gmra.mxu2 %v2555_v18  ;;  %966 = vmatmul.f32.gmra.mxu3 %v2558_v19 }
 0x125   : > { %v742_v29 = vadd.f32 %v741_v13, %v628_v39 }
 0x127   : > { %1580 = vst [vmem:[%s2777_s28 + $0x60] sm:$0xff] %v742_v29  ;;  %1079 = vmatmul.f32.gmra.mxu0 %v2555_v18  ;;  %1192 = vmatmul.f32.gmra.mxu1 %v2558_v19  ;;  %v676_v10 = vpop.f32.mrf.mxu2  ;;  %v789_v11 = vpop.f32.mrf.mxu3 }
 0x128   : > { %v790_v12 = vadd.f32 %v789_v11, %v676_v10 }
 0x12a   : > { %1628 = vst [vmem:[%s2777_s28 + $0x1e0] sm:$0xff] %v790_v12 }
 0x12c   : > { %v631_v52 = vpop.f32.mrf.mxu0  ;;  %v744_v50 = vpop.f32.mrf.mxu1  ;;  %856 = vmatmul.f32.gmra.mxu2 %v2575_v26  ;;  %969 = vmatmul.f32.gmra.mxu3 %v2578_v27 }
 0x12d   : > { %v745_v51 = vadd.f32 %v744_v50, %v631_v52 }
 0x12f   : > { %1583 = vst [vmem:[%s2777_s28 + $0x78] sm:$0xff] %v745_v51  ;;  %1082 = vmatmul.f32.gmra.mxu0 %v2575_v26  ;;  %1195 = vmatmul.f32.gmra.mxu1 %v2578_v27  ;;  %v679_v18 = vpop.f32.mrf.mxu2  ;;  %v792_v19 = vpop.f32.mrf.mxu3 }
 0x130   : > { %v793_v0 = vadd.f32 %v792_v19, %v679_v18 }
 0x132   : > { %1631 = vst [vmem:[%s2777_s28 + $0x1f8] sm:$0xff] %v793_v0 }
 0x134   : > { %v634_v1 = vpop.f32.mrf.mxu0  ;;  %v747_v53 = vpop.f32.mrf.mxu1  ;;  %859 = vmatmul.f32.gmra.mxu2 %v2595_v36  ;;  %972 = vmatmul.f32.gmra.mxu3 %v2598_v37 }
 0x135   : > { %v748_v28 = vadd.f32 %v747_v53, %v634_v1 }
 0x137   : > { %1586 = vst [vmem:[%s2777_s28 + $0x90] sm:$0xff] %v748_v28  ;;  %1085 = vmatmul.f32.gmra.mxu0 %v2595_v36  ;;  %1198 = vmatmul.f32.gmra.mxu1 %v2598_v37  ;;  %v682_v26 = vpop.f32.mrf.mxu2  ;;  %v795_v27 = vpop.f32.mrf.mxu3 }
 0x138   : > { %v796_v62 = vadd.f32 %v795_v27, %v682_v26 }
 0x13a   : > { %1634 = vst [vmem:[%s2777_s28 + $0x210] sm:$0xff] %v796_v62 }
 0x13c   : > { %v637_v63 = vpop.f32.mrf.mxu0  ;;  %v750_v38 = vpop.f32.mrf.mxu1  ;;  %862 = vmatmul.f32.gmra.mxu2 %v2615_v48  ;;  %975 = vmatmul.f32.gmra.mxu3 %v2618_v49 }
 0x13d   : > { %v751_v39 = vadd.f32 %v750_v38, %v637_v63 }
 0x13f   : > { %1589 = vst [vmem:[%s2777_s28 + $0xa8] sm:$0xff] %v751_v39  ;;  %1088 = vmatmul.f32.gmra.mxu0 %v2615_v48  ;;  %1201 = vmatmul.f32.gmra.mxu1 %v2618_v49  ;;  %v685_v36 = vpop.f32.mrf.mxu2  ;;  %v798_v37 = vpop.f32.mrf.mxu3 }
 0x140   : > { %v799_v13 = vadd.f32 %v798_v37, %v685_v36 }
 0x142   : > { %1637 = vst [vmem:[%s2777_s28 + $0x228] sm:$0xff] %v799_v13 }
 0x144   : > { %v640_v29 = vpop.f32.mrf.mxu0  ;;  %v753_v10 = vpop.f32.mrf.mxu1  ;;  %865 = vmatmul.f32.gmra.mxu2 %v2635_v60  ;;  %978 = vmatmul.f32.gmra.mxu3 %v2638_v61 }
 0x145   : > { %v754_v11 = vadd.f32 %v753_v10, %v640_v29 }
 0x147   : > { %1592 = vst [vmem:[%s2777_s28 + $0xc0] sm:$0xff] %v754_v11  ;;  %1091 = vmatmul.f32.gmra.mxu0 %v2635_v60  ;;  %1204 = vmatmul.f32.gmra.mxu1 %v2638_v61  ;;  %v688_v48 = vpop.f32.mrf.mxu2  ;;  %v801_v49 = vpop.f32.mrf.mxu3 }
 0x148   : > { %v802_v12 = vadd.f32 %v801_v49, %v688_v48 }
 0x14a   : > { %1640 = vst [vmem:[%s2777_s28 + $0x240] sm:$0xff] %v802_v12 }
 0x14c   : > { %v643_v52 = vpop.f32.mrf.mxu0  ;;  %v756_v50 = vpop.f32.mrf.mxu1  ;;  %868 = vmatmul.f32.gmra.mxu2 %v2655_v8  ;;  %981 = vmatmul.f32.gmra.mxu3 %v2658_v9 }
 0x14d   : > { %v757_v51 = vadd.f32 %v756_v50, %v643_v52 }
 0x14f   : > { %1595 = vst [vmem:[%s2777_s28 + $0xd8] sm:$0xff] %v757_v51  ;;  %1094 = vmatmul.f32.gmra.mxu0 %v2655_v8  ;;  %1207 = vmatmul.f32.gmra.mxu1 %v2658_v9  ;;  %v691_v60 = vpop.f32.mrf.mxu2  ;;  %v804_v61 = vpop.f32.mrf.mxu3 }
 0x150   : > { %v805_v18 = vadd.f32 %v804_v61, %v691_v60 }
 0x152   : > { %1643 = vst [vmem:[%s2777_s28 + $0x258] sm:$0xff] %v805_v18 }
 0x154   : > { %v646_v19 = vpop.f32.mrf.mxu0  ;;  %v759_v0 = vpop.f32.mrf.mxu1  ;;  %871 = vmatmul.f32.gmra.mxu2 %v2675_v22  ;;  %984 = vmatmul.f32.gmra.mxu3 %v2678_v23 }
 0x155   : > { %v760_v1 = vadd.f32 %v759_v0, %v646_v19 }
 0x157   : > { %1598 = vst [vmem:[%s2777_s28 + $0xf0] sm:$0xff] %v760_v1  ;;  %1097 = vmatmul.f32.gmra.mxu0 %v2675_v22  ;;  %1210 = vmatmul.f32.gmra.mxu1 %v2678_v23  ;;  %v694_v8 = vpop.f32.mrf.mxu2  ;;  %v807_v9 = vpop.f32.mrf.mxu3 }
 0x158   : > { %v808_v53 = vadd.f32 %v807_v9, %v694_v8 }
 0x15a   : > { %1646 = vst [vmem:[%s2777_s28 + $0x270] sm:$0xff] %v808_v53 }
 0x15c   : > { %v649_v28 = vpop.f32.mrf.mxu0  ;;  %v762_v26 = vpop.f32.mrf.mxu1  ;;  %874 = vmatmul.f32.gmra.mxu2 %v2695_v42  ;;  %987 = vmatmul.f32.gmra.mxu3 %v2698_v43 }
 0x15d   : > { %v763_v27 = vadd.f32 %v762_v26, %v649_v28 }
 0x15f   : > { %1601 = vst [vmem:[%s2777_s28 + $0x108] sm:$0xff] %v763_v27  ;;  %1100 = vmatmul.f32.gmra.mxu0 %v2695_v42  ;;  %1213 = vmatmul.f32.gmra.mxu1 %v2698_v43  ;;  %v697_v22 = vpop.f32.mrf.mxu2  ;;  %v810_v23 = vpop.f32.mrf.mxu3 }
 0x160   : > { %v811_v62 = vadd.f32 %v810_v23, %v697_v22 }
 0x162   : > { %1649 = vst [vmem:[%s2777_s28 + $0x288] sm:$0xff] %v811_v62 }
 0x164   : > { %v652_v63 = vpop.f32.mrf.mxu0  ;;  %v765_v38 = vpop.f32.mrf.mxu1  ;;  %877 = vmatmul.f32.gmra.mxu2 %v2715_v2  ;;  %990 = vmatmul.f32.gmra.mxu3 %v2718_v3 }
 0x165   : > { %v766_v39 = vadd.f32 %v765_v38, %v652_v63 }
 0x167   : > { %1604 = vst [vmem:[%s2777_s28 + $0x120] sm:$0xff] %v766_v39  ;;  %1103 = vmatmul.f32.gmra.mxu0 %v2715_v2  ;;  %1216 = vmatmul.f32.gmra.mxu1 %v2718_v3  ;;  %v700_v42 = vpop.f32.mrf.mxu2  ;;  %v813_v43 = vpop.f32.mrf.mxu3 }
 0x168   : > { %v814_v36 = vadd.f32 %v813_v43, %v700_v42 }
 0x16a   : > { %1652 = vst [vmem:[%s2777_s28 + $0x2a0] sm:$0xff] %v814_v36 }
 0x16c   : > { %v655_v37 = vpop.f32.mrf.mxu0  ;;  %v768_v13 = vpop.f32.mrf.mxu1  ;;  %880 = vmatmul.f32.gmra.mxu2 %v2731_v14  ;;  %993 = vmatmul.f32.gmra.mxu3 %v2734_v15 }
 0x16d   : > { %v769_v29 = vadd.f32 %v768_v13, %v655_v37 }
 0x16f   : > { %1607 = vst [vmem:[%s2777_s28 + $0x138] sm:$0xff] %v769_v29  ;;  %1106 = vmatmul.f32.gmra.mxu0 %v2731_v14  ;;  %1219 = vmatmul.f32.gmra.mxu1 %v2734_v15  ;;  %v703_v2 = vpop.f32.mrf.mxu2  ;;  %v816_v3 = vpop.f32.mrf.mxu3 }
 0x170   : > { %v817_v10 = vadd.f32 %v816_v3, %v703_v2 }
 0x172   : > { %1655 = vst [vmem:[%s2777_s28 + $0x2b8] sm:$0xff] %v817_v10 }
 0x174   : > { %v658_v11 = vpop.f32.mrf.mxu0  ;;  %v771_v48 = vpop.f32.mrf.mxu1  ;;  %883 = vmatmul.f32.gmra.mxu2 %v2747_v30  ;;  %996 = vmatmul.f32.gmra.mxu3 %v2750_v31 }
 0x175   : > { %v772_v49 = vadd.f32 %v771_v48, %v658_v11 }
 0x177   : > { %1610 = vst [vmem:[%s2777_s28 + $0x150] sm:$0xff] %v772_v49  ;;  %1109 = vmatmul.f32.gmra.mxu0 %v2747_v30  ;;  %1222 = vmatmul.f32.gmra.mxu1 %v2750_v31  ;;  %v706_v14 = vpop.f32.mrf.mxu2  ;;  %v819_v15 = vpop.f32.mrf.mxu3 }
 0x178   : > { %v820_v12 = vadd.f32 %v819_v15, %v706_v14 }
 0x17a   : > { %1658 = vst [vmem:[%s2777_s28 + $0x2d0] sm:$0xff] %v820_v12 }
 0x17c   : > { %v661_v52 = vpop.f32.mrf.mxu0  ;;  %v774_v50 = vpop.f32.mrf.mxu1  ;;  %886 = vmatmul.f32.gmra.mxu2 %v2763_v54  ;;  %999 = vmatmul.f32.gmra.mxu3 %v2766_v55 }
 0x17d   : > { %v775_v51 = vadd.f32 %v774_v50, %v661_v52 }
 0x17f   : > { %1613 = vst [vmem:[%s2777_s28 + $0x168] sm:$0xff] %v775_v51  ;;  %1112 = vmatmul.f32.gmra.mxu0 %v2763_v54  ;;  %1225 = vmatmul.f32.gmra.mxu1 %v2766_v55  ;;  %v709_v30 = vpop.f32.mrf.mxu2  ;;  %v822_v31 = vpop.f32.mrf.mxu3 }
 0x180   : > { %v823_v60 = vadd.f32 %v822_v31, %v709_v30 }
 0x182   : > { %1661 = vst [vmem:[%s2777_s28 + $0x2e8] sm:$0xff] %v823_v60 }
 0x184   : > { %v1068_v61 = vpop.f32.mrf.mxu0  ;;  %v1181_v18 = vpop.f32.mrf.mxu1  ;;  %889 = vmatmul.f32.gmra.mxu2 %v2455_v34  ;;  %1002 = vmatmul.f32.gmra.mxu3 %v2458_v35 }
 0x185   : > { %v1182_v19 = vadd.f32 %v1181_v18, %v1068_v61 }
 0x187   : > { %1570 = vst [vmem:[%s2777_s28 + $0x10] sm:$0xff] %v1182_v19  ;;  %1115 = vmatmul.f32.gmra.mxu0 %v2455_v34  ;;  %1228 = vmatmul.f32.gmra.mxu1 %v2458_v35  ;;  %v842_v54 = vpop.f32.mrf.mxu2  ;;  %v955_v55 = vpop.f32.mrf.mxu3 }
 0x188   : > { %v956_v0 = vadd.f32 %v955_v55, %v842_v54 }
 0x18a   : > { %1569 = vst [vmem:[%s2777_s28 + $0x8] sm:$0xff] %v956_v0 }
 0x18c   : > { %v1071_v1 = vpop.f32.mrf.mxu0  ;;  %v1184_v8 = vpop.f32.mrf.mxu1  ;;  %892 = vmatmul.f32.gmra.mxu2 %v2479_v46  ;;  %1005 = vmatmul.f32.gmra.mxu3 %v2482_v47 }
 0x18d   : > { %v1185_v9 = vadd.f32 %v1184_v8, %v1071_v1 }
 0x18f   : > { %1573 = vst [vmem:[%s2777_s28 + $0x28] sm:$0xff] %v1185_v9  ;;  %1118 = vmatmul.f32.gmra.mxu0 %v2479_v46  ;;  %1231 = vmatmul.f32.gmra.mxu1 %v2482_v47  ;;  %v845_v34 = vpop.f32.mrf.mxu2  ;;  %v958_v35 = vpop.f32.mrf.mxu3 }
 0x190   : > { %v959_v53 = vadd.f32 %v958_v35, %v845_v34 }
 0x192   : > { %1572 = vst [vmem:[%s2777_s28 + $0x20] sm:$0xff] %v959_v53 }
 0x194   : > { %v1074_v28 = vpop.f32.mrf.mxu0  ;;  %v1187_v26 = vpop.f32.mrf.mxu1  ;;  %895 = vmatmul.f32.gmra.mxu2 %v2503_v58  ;;  %1008 = vmatmul.f32.gmra.mxu3 %v2506_v59 }
 0x195   : > { %v1188_v27 = vadd.f32 %v1187_v26, %v1074_v28  ;;  %v3126_v28 = vld [vmem:[#allocation19_spill] sm:$0xff]  ;;  %v3127_v26 = vld [vmem:[#allocation20_spill] sm:$0xff] }
 0x197   : > { %1576 = vst [vmem:[%s2777_s28 + $0x40] sm:$0xff] %v1188_v27  ;;  %1121 = vmatmul.f32.gmra.mxu0 %v2503_v58  ;;  %1234 = vmatmul.f32.gmra.mxu1 %v2506_v59  ;;  %v848_v46 = vpop.f32.mrf.mxu2  ;;  %v961_v47 = vpop.f32.mrf.mxu3 }
 0x198   : > { %v962_v22 = vadd.f32 %v961_v47, %v848_v46 }
 0x19a   : > { %1575 = vst [vmem:[%s2777_s28 + $0x38] sm:$0xff] %v962_v22 }
 0x19c   : > { %v1077_v23 = vpop.f32.mrf.mxu0  ;;  %v1190_v62 = vpop.f32.mrf.mxu1  ;;  %898 = vmatmul.f32.gmra.mxu2 %v2527_v6  ;;  %1011 = vmatmul.f32.gmra.mxu3 %v2530_v7 }
 0x19d   : > { %v1191_v63 = vadd.f32 %v1190_v62, %v1077_v23  ;;  %v3128_v23 = vld [vmem:[#allocation21_spill] sm:$0xff]  ;;  %v3129_v62 = vld [vmem:[#allocation22_spill] sm:$0xff] }
 0x19f   : > { %1579 = vst [vmem:[%s2777_s28 + $0x58] sm:$0xff] %v1191_v63  ;;  %1124 = vmatmul.f32.gmra.mxu0 %v2527_v6  ;;  %1237 = vmatmul.f32.gmra.mxu1 %v2530_v7  ;;  %v851_v58 = vpop.f32.mrf.mxu2  ;;  %v964_v59 = vpop.f32.mrf.mxu3 }
 0x1a0   : > { %v965_v38 = vadd.f32 %v964_v59, %v851_v58 }
 0x1a2   : > { %1578 = vst [vmem:[%s2777_s28 + $0x50] sm:$0xff] %v965_v38 }
 0x1a4   : > { %v1080_v39 = vpop.f32.mrf.mxu0  ;;  %v1193_v42 = vpop.f32.mrf.mxu1  ;;  %901 = vmatmul.f32.gmra.mxu2 %v2549_v16  ;;  %1014 = vmatmul.f32.gmra.mxu3 %v2552_v17 }
 0x1a5   : > { %v1194_v43 = vadd.f32 %v1193_v42, %v1080_v39 }
 0x1a7   : > { %1582 = vst [vmem:[%s2777_s28 + $0x70] sm:$0xff] %v1194_v43  ;;  %1127 = vmatmul.f32.gmra.mxu0 %v2549_v16  ;;  %1240 = vmatmul.f32.gmra.mxu1 %v2552_v17  ;;  %v854_v6 = vpop.f32.mrf.mxu2  ;;  %v967_v7 = vpop.f32.mrf.mxu3  ;;  %v3130_v43 = vld [vmem:[#allocation23_spill] sm:$0xff] }
 0x1a8   : > { %v968_v36 = vadd.f32 %v967_v7, %v854_v6  ;;  %v3131_v6 = vld [vmem:[#allocation24_spill] sm:$0xff] }
 0x1aa   : > { %1581 = vst [vmem:[%s2777_s28 + $0x68] sm:$0xff] %v968_v36 }
 0x1ac   : > { %v1083_v37 = vpop.f32.mrf.mxu0  ;;  %v1196_v13 = vpop.f32.mrf.mxu1  ;;  %904 = vmatmul.f32.gmra.mxu2 %v2569_v24  ;;  %1017 = vmatmul.f32.gmra.mxu3 %v2572_v25 }
 0x1ad   : > { %v1197_v29 = vadd.f32 %v1196_v13, %v1083_v37 }
 0x1af   : > { %1585 = vst [vmem:[%s2777_s28 + $0x88] sm:$0xff] %v1197_v29  ;;  %1130 = vmatmul.f32.gmra.mxu0 %v2569_v24  ;;  %1243 = vmatmul.f32.gmra.mxu1 %v2572_v25  ;;  %v857_v16 = vpop.f32.mrf.mxu2  ;;  %v970_v17 = vpop.f32.mrf.mxu3 }
 0x1b0   : > { %v971_v2 = vadd.f32 %v970_v17, %v857_v16  ;;  %v3132_v17 = vld [vmem:[#allocation25_spill] sm:$0xff] }
 0x1b2   : > { %1584 = vst [vmem:[%s2777_s28 + $0x80] sm:$0xff] %v971_v2  ;;  %v3133_v2 = vld [vmem:[#allocation26_spill] sm:$0xff] }
 0x1b4   : > { %v1086_v3 = vpop.f32.mrf.mxu0  ;;  %v1199_v10 = vpop.f32.mrf.mxu1  ;;  %907 = vmatmul.f32.gmra.mxu2 %v2589_v32  ;;  %1020 = vmatmul.f32.gmra.mxu3 %v2592_v33 }
 0x1b5   : > { %v1200_v11 = vadd.f32 %v1199_v10, %v1086_v3 }
 0x1b7   : > { %1588 = vst [vmem:[%s2777_s28 + $0xa0] sm:$0xff] %v1200_v11  ;;  %1133 = vmatmul.f32.gmra.mxu0 %v2589_v32  ;;  %1246 = vmatmul.f32.gmra.mxu1 %v2592_v33  ;;  %v860_v24 = vpop.f32.mrf.mxu2  ;;  %v973_v25 = vpop.f32.mrf.mxu3 }
 0x1b8   : > { %v974_v48 = vadd.f32 %v973_v25, %v860_v24 }
 0x1ba   : > { %1587 = vst [vmem:[%s2777_s28 + $0x98] sm:$0xff] %v974_v48 }
 0x1bc   : > { %v1089_v49 = vpop.f32.mrf.mxu0  ;;  %v1202_v14 = vpop.f32.mrf.mxu1  ;;  %910 = vmatmul.f32.gmra.mxu2 %v2609_v44  ;;  %1023 = vmatmul.f32.gmra.mxu3 %v2612_v45 }
 0x1bd   : > { %v1203_v15 = vadd.f32 %v1202_v14, %v1089_v49 }
 0x1bf   : > { %1591 = vst [vmem:[%s2777_s28 + $0xb8] sm:$0xff] %v1203_v15  ;;  %1136 = vmatmul.f32.gmra.mxu0 %v2609_v44  ;;  %1249 = vmatmul.f32.gmra.mxu1 %v2612_v45  ;;  %v863_v32 = vpop.f32.mrf.mxu2  ;;  %v976_v33 = vpop.f32.mrf.mxu3 }
 0x1c0   : > { %v977_v12 = vadd.f32 %v976_v33, %v863_v32 }
 0x1c2   : > { %1590 = vst [vmem:[%s2777_s28 + $0xb0] sm:$0xff] %v977_v12 }
 0x1c4   : > { %v1092_v52 = vpop.f32.mrf.mxu0  ;;  %v1205_v50 = vpop.f32.mrf.mxu1  ;;  %913 = vmatmul.f32.gmra.mxu2 %v2629_v56  ;;  %1026 = vmatmul.f32.gmra.mxu3 %v2632_v57 }
 0x1c5   : > { %v1206_v51 = vadd.f32 %v1205_v50, %v1092_v52 }
 0x1c7   : > { %1594 = vst [vmem:[%s2777_s28 + $0xd0] sm:$0xff] %v1206_v51  ;;  %1139 = vmatmul.f32.gmra.mxu0 %v2629_v56  ;;  %1252 = vmatmul.f32.gmra.mxu1 %v2632_v57  ;;  %v866_v44 = vpop.f32.mrf.mxu2  ;;  %v979_v45 = vpop.f32.mrf.mxu3 }
 0x1c8   : > { %v980_v30 = vadd.f32 %v979_v45, %v866_v44 }
 0x1ca   : > { %1593 = vst [vmem:[%s2777_s28 + $0xc8] sm:$0xff] %v980_v30 }
 0x1cc   : > { %v1095_v31 = vpop.f32.mrf.mxu0  ;;  %v1208_v60 = vpop.f32.mrf.mxu1  ;;  %916 = vmatmul.f32.gmra.mxu2 %v2649_v4  ;;  %1029 = vmatmul.f32.gmra.mxu3 %v2652_v5 }
 0x1cd   : > { %v1209_v61 = vadd.f32 %v1208_v60, %v1095_v31 }
 0x1cf   : > { %1597 = vst [vmem:[%s2777_s28 + $0xe8] sm:$0xff] %v1209_v61  ;;  %1142 = vmatmul.f32.gmra.mxu0 %v2649_v4  ;;  %1255 = vmatmul.f32.gmra.mxu1 %v2652_v5  ;;  %v869_v56 = vpop.f32.mrf.mxu2  ;;  %v982_v57 = vpop.f32.mrf.mxu3 }
 0x1d0   : > { %v983_v18 = vadd.f32 %v982_v57, %v869_v56 }
 0x1d2   : > { %1596 = vst [vmem:[%s2777_s28 + $0xe0] sm:$0xff] %v983_v18 }
 0x1d4   : > { %v1098_v19 = vpop.f32.mrf.mxu0  ;;  %v1211_v54 = vpop.f32.mrf.mxu1  ;;  %919 = vmatmul.f32.gmra.mxu2 %v2669_v20  ;;  %1032 = vmatmul.f32.gmra.mxu3 %v2672_v21 }
 0x1d5   : > { %v1212_v55 = vadd.f32 %v1211_v54, %v1098_v19 }
 0x1d7   : > { %1600 = vst [vmem:[%s2777_s28 + $0x100] sm:$0xff] %v1212_v55  ;;  %1145 = vmatmul.f32.gmra.mxu0 %v2669_v20  ;;  %1258 = vmatmul.f32.gmra.mxu1 %v2672_v21  ;;  %v872_v4 = vpop.f32.mrf.mxu2  ;;  %v985_v5 = vpop.f32.mrf.mxu3 }
 0x1d8   : > { %v986_v0 = vadd.f32 %v985_v5, %v872_v4 }
 0x1da   : > { %1599 = vst [vmem:[%s2777_s28 + $0xf8] sm:$0xff] %v986_v0 }
 0x1dc   : > { %v1101_v1 = vpop.f32.mrf.mxu0  ;;  %v1214_v8 = vpop.f32.mrf.mxu1  ;;  %922 = vmatmul.f32.gmra.mxu2 %v2689_v40  ;;  %1035 = vmatmul.f32.gmra.mxu3 %v2692_v41 }
 0x1dd   : > { %v1215_v9 = vadd.f32 %v1214_v8, %v1101_v1 }
 0x1df   : > { %1603 = vst [vmem:[%s2777_s28 + $0x118] sm:$0xff] %v1215_v9  ;;  %1148 = vmatmul.f32.gmra.mxu0 %v2689_v40  ;;  %1261 = vmatmul.f32.gmra.mxu1 %v2692_v41  ;;  %v875_v20 = vpop.f32.mrf.mxu2  ;;  %v988_v21 = vpop.f32.mrf.mxu3 }
 0x1e0   : > { %v989_v34 = vadd.f32 %v988_v21, %v875_v20 }
 0x1e2   : > { %1602 = vst [vmem:[%s2777_s28 + $0x110] sm:$0xff] %v989_v34 }
 0x1e4   : > { %v1104_v35 = vpop.f32.mrf.mxu0  ;;  %v1217_v53 = vpop.f32.mrf.mxu1  ;;  %925 = vmatmul.f32.gmra.mxu2 %v3126_v28  ;;  %1038 = vmatmul.f32.gmra.mxu3 %v3127_v26 }
 0x1e5   : > { %v1218_v27 = vadd.f32 %v1217_v53, %v1104_v35 }
 0x1e7   : > { %1606 = vst [vmem:[%s2777_s28 + $0x130] sm:$0xff] %v1218_v27  ;;  %1151 = vmatmul.f32.gmra.mxu0 %v3126_v28  ;;  %1264 = vmatmul.f32.gmra.mxu1 %v3127_v26  ;;  %v878_v40 = vpop.f32.mrf.mxu2  ;;  %v991_v41 = vpop.f32.mrf.mxu3 }
 0x1e8   : > { %v992_v46 = vadd.f32 %v991_v41, %v878_v40 }
 0x1ea   : > { %1605 = vst [vmem:[%s2777_s28 + $0x128] sm:$0xff] %v992_v46 }
 0x1ec   : > { %v1107_v47 = vpop.f32.mrf.mxu0  ;;  %v1220_v22 = vpop.f32.mrf.mxu1  ;;  %928 = vmatmul.f32.gmra.mxu2 %v3128_v23  ;;  %1041 = vmatmul.f32.gmra.mxu3 %v3129_v62 }
 0x1ed   : > { %v1221_v63 = vadd.f32 %v1220_v22, %v1107_v47 }
 0x1ef   : > { %1609 = vst [vmem:[%s2777_s28 + $0x148] sm:$0xff] %v1221_v63  ;;  %1154 = vmatmul.f32.gmra.mxu0 %v3128_v23  ;;  %1267 = vmatmul.f32.gmra.mxu1 %v3129_v62  ;;  %v881_v58 = vpop.f32.mrf.mxu2  ;;  %v994_v59 = vpop.f32.mrf.mxu3 }
 0x1f0   : > { %v995_v38 = vadd.f32 %v994_v59, %v881_v58 }
 0x1f2   : > { %1608 = vst [vmem:[%s2777_s28 + $0x140] sm:$0xff] %v995_v38 }
 0x1f4   : > { %v1110_v39 = vpop.f32.mrf.mxu0  ;;  %v1223_v42 = vpop.f32.mrf.mxu1  ;;  %931 = vmatmul.f32.gmra.mxu2 %v3130_v43  ;;  %1044 = vmatmul.f32.gmra.mxu3 %v3131_v6 }
 0x1f5   : > { %v1224_v7 = vadd.f32 %v1223_v42, %v1110_v39 }
 0x1f7   : > { %1612 = vst [vmem:[%s2777_s28 + $0x160] sm:$0xff] %v1224_v7  ;;  %1157 = vmatmul.f32.gmra.mxu0 %v3130_v43  ;;  %1270 = vmatmul.f32.gmra.mxu1 %v3131_v6  ;;  %v884_v36 = vpop.f32.mrf.mxu2  ;;  %v997_v37 = vpop.f32.mrf.mxu3 }
 0x1f8   : > { %v998_v13 = vadd.f32 %v997_v37, %v884_v36 }
 0x1fa   : > { %1611 = vst [vmem:[%s2777_s28 + $0x158] sm:$0xff] %v998_v13 }
 0x1fc   : > { %v1113_v29 = vpop.f32.mrf.mxu0  ;;  %v1226_v16 = vpop.f32.mrf.mxu1  ;;  %934 = vmatmul.f32.gmra.mxu2 %v3132_v17  ;;  %1047 = vmatmul.f32.gmra.mxu3 %v3133_v2 }
 0x1fd   : > { %v1227_v3 = vadd.f32 %v1226_v16, %v1113_v29 }
 0x1ff   : > { %1615 = vst [vmem:[%s2777_s28 + $0x178] sm:$0xff] %v1227_v3  ;;  %1160 = vmatmul.f32.gmra.mxu0 %v3132_v17  ;;  %1273 = vmatmul.f32.gmra.mxu1 %v3133_v2  ;;  %v887_v10 = vpop.f32.mrf.mxu2  ;;  %v1000_v11 = vpop.f32.mrf.mxu3 }
 0x200   : > { %v1001_v24 = vadd.f32 %v1000_v11, %v887_v10 }
 0x202   : > { %1614 = vst [vmem:[%s2777_s28 + $0x170] sm:$0xff] %v1001_v24 }
 0x204   : > { %v1116_v25 = vpop.f32.mrf.mxu0  ;;  %v1229_v48 = vpop.f32.mrf.mxu1 }
 0x205   : > { %v1230_v49 = vadd.f32 %v1229_v48, %v1116_v25 }
 0x207   : > { %1618 = vst [vmem:[%s2777_s28 + $0x190] sm:$0xff] %v1230_v49  ;;  %v890_v14 = vpop.f32.mrf.mxu2  ;;  %v1003_v15 = vpop.f32.mrf.mxu3 }
 0x208   : > { %v1004_v32 = vadd.f32 %v1003_v15, %v890_v14 }
 0x20a   : > { %1617 = vst [vmem:[%s2777_s28 + $0x188] sm:$0xff] %v1004_v32 }
 0x20c   : > { %v1119_v33 = vpop.f32.mrf.mxu0  ;;  %v1232_v12 = vpop.f32.mrf.mxu1 }
 0x20d   : > { %v1233_v52 = vadd.f32 %v1232_v12, %v1119_v33 }
 0x20f   : > { %1621 = vst [vmem:[%s2777_s28 + $0x1a8] sm:$0xff] %v1233_v52  ;;  %v893_v50 = vpop.f32.mrf.mxu2  ;;  %v1006_v51 = vpop.f32.mrf.mxu3 }
 0x210   : > { %v1007_v44 = vadd.f32 %v1006_v51, %v893_v50 }
 0x212   : > { %1620 = vst [vmem:[%s2777_s28 + $0x1a0] sm:$0xff] %v1007_v44 }
 0x214   : > { %v1122_v45 = vpop.f32.mrf.mxu0  ;;  %v1235_v30 = vpop.f32.mrf.mxu1 }
 0x215   : > { %v1236_v31 = vadd.f32 %v1235_v30, %v1122_v45 }
 0x217   : > { %1624 = vst [vmem:[%s2777_s28 + $0x1c0] sm:$0xff] %v1236_v31  ;;  %v896_v60 = vpop.f32.mrf.mxu2  ;;  %v1009_v61 = vpop.f32.mrf.mxu3 }
 0x218   : > { %v1010_v56 = vadd.f32 %v1009_v61, %v896_v60 }
 0x21a   : > { %1623 = vst [vmem:[%s2777_s28 + $0x1b8] sm:$0xff] %v1010_v56 }
 0x21c   : > { %v1125_v57 = vpop.f32.mrf.mxu0  ;;  %v1238_v18 = vpop.f32.mrf.mxu1 }
 0x21d   : > { %v1239_v19 = vadd.f32 %v1238_v18, %v1125_v57 }
 0x21f   : > { %1627 = vst [vmem:[%s2777_s28 + $0x1d8] sm:$0xff] %v1239_v19  ;;  %v899_v54 = vpop.f32.mrf.mxu2  ;;  %v1012_v55 = vpop.f32.mrf.mxu3 }
 0x220   : > { %v1013_v4 = vadd.f32 %v1012_v55, %v899_v54 }
 0x222   : > { %1626 = vst [vmem:[%s2777_s28 + $0x1d0] sm:$0xff] %v1013_v4 }
 0x224   : > { %v1128_v5 = vpop.f32.mrf.mxu0  ;;  %v1241_v0 = vpop.f32.mrf.mxu1 }
 0x225   : > { %v1242_v1 = vadd.f32 %v1241_v0, %v1128_v5 }
 0x227   : > { %1630 = vst [vmem:[%s2777_s28 + $0x1f0] sm:$0xff] %v1242_v1  ;;  %v902_v8 = vpop.f32.mrf.mxu2  ;;  %v1015_v9 = vpop.f32.mrf.mxu3 }
 0x228   : > { %v1016_v20 = vadd.f32 %v1015_v9, %v902_v8 }
 0x22a   : > { %1629 = vst [vmem:[%s2777_s28 + $0x1e8] sm:$0xff] %v1016_v20 }
 0x22c   : > { %v1131_v21 = vpop.f32.mrf.mxu0  ;;  %v1244_v34 = vpop.f32.mrf.mxu1 }
 0x22d   : > { %v1245_v35 = vadd.f32 %v1244_v34, %v1131_v21 }
 0x22f   : > { %1633 = vst [vmem:[%s2777_s28 + $0x208] sm:$0xff] %v1245_v35  ;;  %v905_v53 = vpop.f32.mrf.mxu2  ;;  %v1018_v28 = vpop.f32.mrf.mxu3 }
 0x230   : > { %v1019_v26 = vadd.f32 %v1018_v28, %v905_v53 }
 0x232   : > { %1632 = vst [vmem:[%s2777_s28 + $0x200] sm:$0xff] %v1019_v26 }
 0x234   : > { %v1134_v27 = vpop.f32.mrf.mxu0  ;;  %v1247_v40 = vpop.f32.mrf.mxu1 }
 0x235   : > { %v1248_v41 = vadd.f32 %v1247_v40, %v1134_v27 }
 0x237   : > { %1636 = vst [vmem:[%s2777_s28 + $0x220] sm:$0xff] %v1248_v41  ;;  %v908_v46 = vpop.f32.mrf.mxu2  ;;  %v1021_v47 = vpop.f32.mrf.mxu3 }
 0x238   : > { %v1022_v22 = vadd.f32 %v1021_v47, %v908_v46 }
 0x23a   : > { %1635 = vst [vmem:[%s2777_s28 + $0x218] sm:$0xff] %v1022_v22 }
 0x23c   : > { %v1137_v23 = vpop.f32.mrf.mxu0  ;;  %v1250_v62 = vpop.f32.mrf.mxu1 }
 0x23d   : > { %v1251_v63 = vadd.f32 %v1250_v62, %v1137_v23 }
 0x23f   : > { %1639 = vst [vmem:[%s2777_s28 + $0x238] sm:$0xff] %v1251_v63  ;;  %v911_v58 = vpop.f32.mrf.mxu2  ;;  %v1024_v59 = vpop.f32.mrf.mxu3 }
 0x240   : > { %v1025_v38 = vadd.f32 %v1024_v59, %v911_v58 }
 0x242   : > { %1638 = vst [vmem:[%s2777_s28 + $0x230] sm:$0xff] %v1025_v38 }
 0x244   : > { %v1140_v39 = vpop.f32.mrf.mxu0  ;;  %v1253_v42 = vpop.f32.mrf.mxu1 }
 0x245   : > { %v1254_v43 = vadd.f32 %v1253_v42, %v1140_v39 }
 0x247   : > { %1642 = vst [vmem:[%s2777_s28 + $0x250] sm:$0xff] %v1254_v43  ;;  %v914_v6 = vpop.f32.mrf.mxu2  ;;  %v1027_v7 = vpop.f32.mrf.mxu3 }
 0x248   : > { %v1028_v36 = vadd.f32 %v1027_v7, %v914_v6 }
 0x24a   : > { %1641 = vst [vmem:[%s2777_s28 + $0x248] sm:$0xff] %v1028_v36 }
 0x24c   : > { %v1143_v37 = vpop.f32.mrf.mxu0  ;;  %v1256_v13 = vpop.f32.mrf.mxu1 }
 0x24d   : > { %v1257_v29 = vadd.f32 %v1256_v13, %v1143_v37 }
 0x24f   : > { %1645 = vst [vmem:[%s2777_s28 + $0x268] sm:$0xff] %v1257_v29  ;;  %v917_v16 = vpop.f32.mrf.mxu2  ;;  %v1030_v17 = vpop.f32.mrf.mxu3 }
 0x250   : > { %v1031_v2 = vadd.f32 %v1030_v17, %v917_v16 }
 0x252   : > { %1644 = vst [vmem:[%s2777_s28 + $0x260] sm:$0xff] %v1031_v2 }
 0x254   : > { %v1146_v3 = vpop.f32.mrf.mxu0  ;;  %v1259_v10 = vpop.f32.mrf.mxu1 }
 0x255   : > { %v1260_v11 = vadd.f32 %v1259_v10, %v1146_v3 }
 0x257   : > { %1648 = vst [vmem:[%s2777_s28 + $0x280] sm:$0xff] %v1260_v11  ;;  %v920_v24 = vpop.f32.mrf.mxu2  ;;  %v1033_v25 = vpop.f32.mrf.mxu3 }
 0x258   : > { %v1034_v48 = vadd.f32 %v1033_v25, %v920_v24 }
 0x25a   : > { %1647 = vst [vmem:[%s2777_s28 + $0x278] sm:$0xff] %v1034_v48 }
 0x25c   : > { %v1149_v49 = vpop.f32.mrf.mxu0  ;;  %v1262_v14 = vpop.f32.mrf.mxu1 }
 0x25d   : > { %v1263_v15 = vadd.f32 %v1262_v14, %v1149_v49 }
 0x25f   : > { %1651 = vst [vmem:[%s2777_s28 + $0x298] sm:$0xff] %v1263_v15  ;;  %v923_v32 = vpop.f32.mrf.mxu2  ;;  %v1036_v33 = vpop.f32.mrf.mxu3 }
 0x260   : > { %v1037_v12 = vadd.f32 %v1036_v33, %v923_v32 }
 0x262   : > { %1650 = vst [vmem:[%s2777_s28 + $0x290] sm:$0xff] %v1037_v12 }
 0x264   : > { %v1152_v52 = vpop.f32.mrf.mxu0  ;;  %v1265_v50 = vpop.f32.mrf.mxu1 }
 0x265   : > { %v1266_v51 = vadd.f32 %v1265_v50, %v1152_v52 }
 0x267   : > { %1654 = vst [vmem:[%s2777_s28 + $0x2b0] sm:$0xff] %v1266_v51  ;;  %v926_v44 = vpop.f32.mrf.mxu2  ;;  %v1039_v45 = vpop.f32.mrf.mxu3 }
 0x268   : > { %v1040_v30 = vadd.f32 %v1039_v45, %v926_v44 }
 0x26a   : > { %1653 = vst [vmem:[%s2777_s28 + $0x2a8] sm:$0xff] %v1040_v30 }
 0x26c   : > { %v1155_v31 = vpop.f32.mrf.mxu0  ;;  %v1268_v60 = vpop.f32.mrf.mxu1 }
 0x26d   : > { %v1269_v61 = vadd.f32 %v1268_v60, %v1155_v31 }
 0x26f   : > { %1657 = vst [vmem:[%s2777_s28 + $0x2c8] sm:$0xff] %v1269_v61  ;;  %v929_v56 = vpop.f32.mrf.mxu2  ;;  %v1042_v57 = vpop.f32.mrf.mxu3 }
 0x270   : > { %v1043_v18 = vadd.f32 %v1042_v57, %v929_v56 }
 0x272   : > { %1656 = vst [vmem:[%s2777_s28 + $0x2c0] sm:$0xff] %v1043_v18 }
 0x274   : > { %v1158_v19 = vpop.f32.mrf.mxu0  ;;  %v1271_v54 = vpop.f32.mrf.mxu1 }
 0x275   : > { %v1272_v55 = vadd.f32 %v1271_v54, %v1158_v19 }
 0x277   : > { %1660 = vst [vmem:[%s2777_s28 + $0x2e0] sm:$0xff] %v1272_v55  ;;  %v932_v4 = vpop.f32.mrf.mxu2  ;;  %v1045_v5 = vpop.f32.mrf.mxu3 }
 0x278   : > { %v1046_v0 = vadd.f32 %v1045_v5, %v932_v4 }
 0x27a   : > { %1659 = vst [vmem:[%s2777_s28 + $0x2d8] sm:$0xff] %v1046_v0 }
 0x27c   : > { %v1161_v1 = vpop.f32.mrf.mxu0  ;;  %v1274_v8 = vpop.f32.mrf.mxu1 }
 0x27d   : > { %v1275_v9 = vadd.f32 %v1274_v8, %v1161_v1 }
 0x27f   : > { %1663 = vst [vmem:[%s2777_s28 + $0x2f8] sm:$0xff] %v1275_v9  ;;  %v935_v20 = vpop.f32.mrf.mxu2  ;;  %v1048_v21 = vpop.f32.mrf.mxu3 }
 0x280   : > { %v1049_v34 = vadd.f32 %v1048_v21, %v935_v20 }
 0x282   : > { %1662 = vst [vmem:[%s2777_s28 + $0x2f0] sm:$0xff] %v1049_v34 }
 0x283   : > { %2083 = shalt.err (!%p2080_p10)
}
 0x284   : > { %s2210_s17 = smov 384   ;;  %s2211_s28 = smov 768  }
 0x285   : > { %s2212_s27 = smov 24  }
 0x286   : > { %1864 = dma.vmem_to_hbm [thread:$0]  (%p2374_p1), %s1681_s29, 12288, %s1683_s15, %s1665_s24, %s2210_s17, %s2211_s28, %s2212_s27  }
 0x287 PF: > { %p1878_p12 = scmp.ge.s32.totalorder %s2206_s22, 2  ;;  %s1697_s30 = sand.u32 1, %s2154_s9  }
 0x288   : > { %s1698_s7 = scalar_lea.sflag [#allocation5], %s1697_s30 }
 0x289   : > { %p1874_p3 = pnand %p1878_p12, %p2389_p5 }
 0x28b   : > { %p1875_p13 = pneg %p1874_p3 }
 0x28d   : > { %2149 = dma.done.wait (%p1875_p13), %s1698_s7, 12288  }
 0x28e   : > { %2151 = vsyncadd (%p1875_p13), %s1698_s7, 4294955008  ;;  %s21_s22 = sadd.s32 1, %s2206_s22   ;;  %s3137_s4 = sld [smem:[#allocation12_spill]] }
 0x28f   : > { %p3024_p0 = scmp.ge.s32.totalorder %s21_s22, 6   ;;  %s3138_s17 = sld [smem:[#allocation18_spill]] }
 0x290   : > { %s3139_s8 = sld [smem:[#allocation14_spill]]  ;;  %s3144_s9 = smov %s2158_s10 }
 0x291   : > { %s3140_s19 = sld [smem:[#allocation15_spill]]  ;;  %s3145_s10 = smov %s2162_s11 }
 0x292   : > { %s3141_s20 = sld [smem:[#allocation16_spill]]  ;;  %s3146_s11 = smov %s2386_s6 }
 0x293   : > { %s3142_s21 = sld [smem:[#allocation17_spill]]  ;;  %s3147_s12 = smov %s2170_s13 }
 0x294   : > { %s3148_s13 = smov %s2174_s14  ;;  %s3149_s14 = smov %s2368_s23 }
 0x295   : > { %s3150_s15 = smov %s2182_s16  ;;  %s3151_s16 = smov %s3137_s4 }
 0x296   : > { %s3152_s18 = smov %s3139_s8  ;;  %20 = sbr.rel (!%p3024_p0) target bundleno = 15 (0xf), region = 94 }
 0x29b   :  { %1704 = vsyncpa [#allocation4], 1 }
 0x29c   :  { %1706 = vsyncpa [#allocation4 + $0x1], 1 }
 0x29d   :  { %1707 = vsyncpa [#allocation7], 1 }
 0x29e   :  { %1709 = vsyncpa [#allocation7 + $0x1], 1 }
 0x29f   :  { %1710 = vsyncpa [#allocation5], 1 }
 0x2a0   :  { %1712 = vsyncpa [#allocation5 + $0x1], 1 }

</bundles_post_ra>
